<compile_context>
chip_gen: v5e
topology: v5e:2x2
jax: 0.10.0
libtpu: 0.0.40
codegen_flags: <defaults>
</compile_context>

<pallas_src>
import jax
import jax.numpy as jnp
from jax import lax
from jax.experimental import pallas as pl
from jax.experimental.pallas import tpu as pltpu

EPS = 1e-5


# ------------------------------- kernel body ----------------------------------
def _make_kernel(H, W, c2m, c3m):
    P = H * W

    def inception_kernel(x_ref, wred_ref, bred_ref, wbig_ref, bbig_ref, y_ref):
        Nb = x_ref.shape[0]
        x = x_ref[...]                                     # (Nb, Cin, P) f32

        # Per-pixel column index inside each image's row-major flattened H*W.
        w_idx = lax.broadcasted_iota(jnp.int32, (1, 1, P), 2) % W
        wmask = {dw: (w_idx + dw >= 0) & (w_idx + dw < W)
                 for dw in (-2, -1, 1, 2)}

        def shift(t, dh, dw, fill):
            """out[..., h*W+w] = t[..., (h+dh)*W + (w+dw)]; `fill` when OOB."""
            s = dh * W + dw
            f = jnp.asarray(fill, t.dtype)
            out = t
            if s > 0:
                pad = jnp.full(t.shape[:-1] + (s,), f, t.dtype)
                out = jnp.concatenate([t[..., s:], pad], axis=-1)
            elif s < 0:
                pad = jnp.full(t.shape[:-1] + (-s,), f, t.dtype)
                out = jnp.concatenate([pad, t[..., :s]], axis=-1)
            if dw != 0:     # source column wrapped into a neighbouring row
                out = jnp.where(wmask[dw], out, f)
            return out

        # ---- branch-2/3 1x1 reduce convs (plain conv bias, no BN / ReLU) ----
        xb = x.astype(jnp.bfloat16)
        wred = wred_ref[...]                               # (c2m+c3m, Cin) bf16
        red = jnp.stack(
            [jnp.dot(wred, xb[i], preferred_element_type=jnp.float32)
             for i in range(Nb)], axis=0) + bred_ref[...]  # (Nb, c2m+c3m, P) f32
        t2 = red[:, :c2m, :].astype(jnp.bfloat16)
        t3 = red[:, c2m:c2m + c3m, :].astype(jnp.bfloat16)

        # ---- branch-4 3x3 maxpool pad=1, separable 3-tap max (f32 VPU) ------
        neg = -1e30
        rw = jnp.maximum(jnp.maximum(shift(x, 0, -1, neg), x),
                         shift(x, 0, 1, neg))
        pooled = jnp.maximum(jnp.maximum(shift(rw, -1, 0, neg), rw),
                             shift(rw, 1, 0, neg))

        # ---- im2col columns for the single fused matmul (bf16, zero pad) ----
        pieces = [xb]                                                  # branch 1
        for dh in (-1, 0, 1):                                          # branch 2
            for dw in (-1, 0, 1):
                pieces.append(shift(t2, dh, dw, 0.0))
        for dh in (-2, -1, 0, 1, 2):                                   # branch 3
            for dw in (-2, -1, 0, 1, 2):
                pieces.append(shift(t3, dh, dw, 0.0))
        pieces.append(pooled.astype(jnp.bfloat16))                     # branch 4
        cols = jnp.concatenate(pieces, axis=1)                         # (Nb, K, P)

        # ---- one block-diagonal MXU matmul -> all branches, torch.cat order -
        wbig = wbig_ref[...]                               # (ctot, K) bf16
        bbig = bbig_ref[...]                               # (ctot, 1) f32
        for i in range(Nb):
            yi = jnp.dot(wbig, cols[i],
                         preferred_element_type=jnp.float32) + bbig
            y_ref[i] = jnp.maximum(yi, 0.0)                # fused ReLU, lane-dense

    return inception_kernel


# --------------------------------- wrapper ------------------------------------
def inception_forward(x_nchw, kparams, *, max_images_per_step=16):
    """x_nchw: (N, Cin, H, W) f32. Returns (N, c1+c2[1]+c3[1]+c4, H, W) f32."""
    N, Cin, H, W = x_nchw.shape
    P = H * W
    w_red, b_red, w_big, b_big, dims = kparams
    c1, c2m, c2, c3m, c3, c4 = dims
    ctot = c1 + c2 + c3 + c4
    K = w_big.shape[1]

    # Free metadata reshape: NCHW -> (N, C, H*W); pixels land on the lane dim.
    x3 = x_nchw.reshape(N, Cin, P).astype(jnp.float32)

    # Images per grid step: large enough to amortize the ~0.35us per-step
    # pipeline overhead, small enough for VMEM (budget stays far under the
    # 32 MiB scoped default, so it also fits v7x's 64 MiB physical VMEM), and
    # keep >= 2 grid steps when possible so both v7x TensorCores get work.
    per_img = P * (Cin * 4 + ctot * 8 + 3 * K * 2 + (c2m + c3m) * 8 + Cin * 8)
    nb = max(1, min(max_images_per_step, (12 << 20) // max(per_img, 1), N))
    while nb > 1 and (N % nb != 0 or N // nb < 2):
        nb -= 1

    kernel = _make_kernel(H, W, c2m, c3m)
    weights = [w_red, b_red, w_big, b_big]

    def full_spec(a):
        nd = a.ndim
        return pl.BlockSpec(a.shape, lambda n, _nd=nd: (0,) * _nd)

    in_specs = [pl.BlockSpec((nb, Cin, P), lambda n: (n, 0, 0))] + \
               [full_spec(a) for a in weights]
    out_specs = pl.BlockSpec((nb, ctot, P), lambda n: (n, 0, 0))

    vmem_limit = int(min(max(2 * nb * per_img + (8 << 20), 32 << 20), 64 << 20))

    y = pl.pallas_call(
        kernel,
        out_shape=jax.ShapeDtypeStruct((N, ctot, P), jnp.float32),
        grid_spec=pltpu.PrefetchScalarGridSpec(
            num_scalar_prefetch=0,
            grid=(N // nb,),
            in_specs=in_specs,
            out_specs=out_specs,
        ),
        compiler_params=pltpu.CompilerParams(
            dimension_semantics=("parallel",),
            vmem_limit_bytes=vmem_limit),
    )(x3, *weights)

    return y.reshape(N, ctot, H, W)   # free reshape; already NCHW channel order


# ------------------------------ parameter setup --------------------------------
def init_params(key, in_c, c1, c2, c3, c4):
    ks = jax.random.split(key, 16)

    def conv_w(k, kh, kw, ci, co):
        return jax.random.normal(k, (kh, kw, ci, co), jnp.float32) * 0.1   # HWIO

    def conv_b(k, co):
        return jax.random.normal(k, (co,), jnp.float32) * 0.1

    def bn(k, co):
        k1, k2, k3, k4 = jax.random.split(k, 4)
        gamma = jax.random.uniform(k1, (co,), jnp.float32, 0.5, 1.5)
        beta = jax.random.normal(k2, (co,), jnp.float32) * 0.1
        mean = jax.random.normal(k3, (co,), jnp.float32) * 0.1
        var = jax.random.uniform(k4, (co,), jnp.float32, 0.5, 1.5)
        return gamma, beta, mean, var

    return {
        'p1_conv_w': conv_w(ks[0], 1, 1, in_c, c1), 'p1_conv_b': conv_b(ks[1], c1),
        'p1_bn': bn(ks[2], c1),
        'p2_conv1_w': conv_w(ks[3], 1, 1, in_c, c2[0]), 'p2_conv1_b': conv_b(ks[4], c2[0]),
        'p2_conv3_w': conv_w(ks[5], 3, 3, c2[0], c2[1]), 'p2_conv3_b': conv_b(ks[6], c2[1]),
        'p2_bn': bn(ks[7], c2[1]),
        'p3_conv1_w': conv_w(ks[8], 1, 1, in_c, c3[0]), 'p3_conv1_b': conv_b(ks[9], c3[0]),
        'p3_conv5_w': conv_w(ks[10], 5, 5, c3[0], c3[1]), 'p3_conv5_b': conv_b(ks[11], c3[1]),
        'p3_bn': bn(ks[12], c3[1]),
        'p4_conv_w': conv_w(ks[13], 1, 1, in_c, c4), 'p4_conv_b': conv_b(ks[14], c4),
        'p4_bn': bn(ks[15], c4),
    }


def fold_bn(w, b, bn_params):
    # Inference-mode BatchNorm folded into preceding conv (w: HWIO, scale on O).
    gamma, beta, mean, var = bn_params
    scale = gamma / jnp.sqrt(var + EPS)
    return w * scale, (b - mean) * scale + beta


def pack_kernel_params(raw):
    w1, b1 = fold_bn(raw['p1_conv_w'], raw['p1_conv_b'], raw['p1_bn'])
    w2b, b2b = fold_bn(raw['p2_conv3_w'], raw['p2_conv3_b'], raw['p2_bn'])
    w3b, b3b = fold_bn(raw['p3_conv5_w'], raw['p3_conv5_b'], raw['p3_bn'])
    w4, b4 = fold_bn(raw['p4_conv_w'], raw['p4_conv_b'], raw['p4_bn'])
    w2a, b2a = raw['p2_conv1_w'][0, 0], raw['p2_conv1_b']   # (Cin, c2m), (c2m,)
    w3a, b3a = raw['p3_conv1_w'][0, 0], raw['p3_conv1_b']

    in_c = w2a.shape[0]
    c1, c2m, c2 = w1.shape[-1], w2a.shape[-1], w2b.shape[-1]
    c3m, c3, c4c = w3a.shape[-1], w3b.shape[-1], w4.shape[-1]
    ctot = c1 + c2 + c3 + c4c

    # Fused 1x1 "reduce" stem for branches 2/3 (plain conv bias, no BN/ReLU).
    w_red = jnp.concatenate([w2a.T, w3a.T], axis=0).astype(jnp.bfloat16)
    b_red = jnp.concatenate([b2a, b3a]).reshape(-1, 1).astype(jnp.float32)

    # Block-diagonal fused weight producing all four branches in one matmul.
    #   K layout : [ x (Cin) | im2col(t2) (9*c2m) | im2col(t3) (25*c3m) | pooled (Cin) ]
    #   Out rows : [ c1 | c2 | c3 | c4 ]  == torch.cat((p1,p2,p3,p4), dim=1) order.
    blocks = [w1[0, 0].T,                    # (c1, Cin)       BN folded
              w2b.reshape(9 * c2m, c2).T,    # (c2, 9*c2m)     (kh, kw, ci) flat
              w3b.reshape(25 * c3m, c3).T,   # (c3, 25*c3m)
              w4[0, 0].T]                    # (c4, Cin)
    ksizes = [in_c, 9 * c2m, 25 * c3m, in_c]
    osizes = [c1, c2, c3, c4c]
    w_big = jnp.zeros((ctot, sum(ksizes)), jnp.float32)
    ro = ko = 0
    for blk, o, k in zip(blocks, osizes, ksizes):
        w_big = w_big.at[ro:ro + o, ko:ko + k].set(blk)
        ro += o
        ko += k
    w_big = w_big.astype(jnp.bfloat16)
    b_big = jnp.concatenate([b1, b2b, b3b, b4]).reshape(-1, 1).astype(jnp.float32)

    return (w_red, b_red, w_big, b_big, (c1, c2m, c2, c3m, c3, c4c))


# ------------------------------ pure-JAX reference -----------------------------
def ref_forward(x_nchw, raw):
    x = jnp.transpose(x_nchw, (0, 2, 3, 1))

    def conv(t, w, b, pad):
        y = lax.conv_general_dilated(
            t, w, window_strides=(1, 1), padding=[(pad, pad), (pad, pad)],
            dimension_numbers=('NHWC', 'HWIO', 'NHWC'),
            preferred_element_type=jnp.float32)
        return y + b

    def bn_relu(t, bn_params):
        gamma, beta, mean, var = bn_params
        return jnp.maximum((t - mean) / jnp.sqrt(var + EPS) * gamma + beta, 0.0)

    p1 = bn_relu(conv(x, raw['p1_conv_w'], raw['p1_conv_b'], 0), raw['p1_bn'])
    p2 = conv(x, raw['p2_conv1_w'], raw['p2_conv1_b'], 0)
    p2 = bn_relu(conv(p2, raw['p2_conv3_w'], raw['p2_conv3_b'], 1), raw['p2_bn'])
    p3 = conv(x, raw['p3_conv1_w'], raw['p3_conv1_b'], 0)
    p3 = bn_relu(conv(p3, raw['p3_conv5_w'], raw['p3_conv5_b'], 2), raw['p3_bn'])
    pooled = lax.reduce_window(x, -jnp.inf, lax.max, (1, 3, 3, 1), (1, 1, 1, 1),
                               [(0, 0), (1, 1), (1, 1), (0, 0)])
    p4 = bn_relu(conv(pooled, raw['p4_conv_w'], raw['p4_conv_b'], 0), raw['p4_bn'])
    out = jnp.concatenate([p1, p2, p3, p4], axis=-1)
    return jnp.transpose(out, (0, 3, 1, 2))


if __name__ == "__main__":
    key = jax.random.PRNGKey(0)
    kx, kp = jax.random.split(key)

    N, in_c, H, W = 2, 4, 16, 16
    c1, c2, c3, c4 = 8, (8, 16), (4, 8), 8

    x = jax.random.normal(kx, (N, in_c, H, W), jnp.float32)
    raw = init_params(kp, in_c, c1, c2, c3, c4)
    kparams = pack_kernel_params(raw)

    out = jax.block_until_ready(inception_forward(x, kparams))
    ref = jax.block_until_ready(ref_forward(x, raw))

    assert out.shape == (N, c1 + c2[1] + c3[1] + c4, H, W), out.shape
    # bf16 MXU inputs with f32 accumulation vs. f32 XLA conv: loose tolerance.
    if not jnp.allclose(out, ref, atol=5e-2, rtol=5e-2):
        raise AssertionError(
            f"mismatch vs reference, max abs err = {jnp.max(jnp.abs(out - ref))}")
    print("KERNEL_OK")
</pallas_src>

<mosaic_0001>
module attributes {stable_mosaic.version = 11 : i64} {
  func.func @inception_kernel(%arg0: i32, %arg1: memref<1x4x256xf32, #tpu.memory_space<vmem>>, %arg2: memref<12x4xbf16, #tpu.memory_space<vmem>>, %arg3: memref<12x1xf32, #tpu.memory_space<vmem>>, %arg4: memref<40x180xbf16, #tpu.memory_space<vmem>>, %arg5: memref<40x1xf32, #tpu.memory_space<vmem>>, %arg6: memref<1x40x256xf32, #tpu.memory_space<vmem>>) attributes {dimension_semantics = [#tpu.dimension_semantics<parallel>], iteration_bounds = array<i64: 2>, scalar_prefetch = 0 : i64, scratch_operands = 0 : i64, tpu.core_type = #tpu.core_type<tc>, window_params = [{transform_indices = @transform_0, window_bounds = array<i64: 1, 4, 256>}, {pipeline_mode = #tpu.pipeline_mode<synchronous>, transform_indices = @transform_1, window_bounds = array<i64: 12, 4>}, {pipeline_mode = #tpu.pipeline_mode<synchronous>, transform_indices = @transform_2, window_bounds = array<i64: 12, 1>}, {pipeline_mode = #tpu.pipeline_mode<synchronous>, transform_indices = @transform_3, window_bounds = array<i64: 40, 180>}, {pipeline_mode = #tpu.pipeline_mode<synchronous>, transform_indices = @transform_4, window_bounds = array<i64: 40, 1>}, {transform_indices = @transform_5, window_bounds = array<i64: 1, 40, 256>}]} {
    %c0 = arith.constant 0 : index
    %c0_0 = arith.constant 0 : index
    %c0_1 = arith.constant 0 : index
    %0 = vector.load %arg1[%c0, %c0_0, %c0_1] : memref<1x4x256xf32, #tpu.memory_space<vmem>>, vector<1x4x256xf32>
    %1 = tpu.iota {dimensions = array<i32: 2>} : vector<1x1x256xi32>
    %c16_i32 = arith.constant 16 : i32
    %c0_i32 = arith.constant 0 : i32
    %2 = arith.cmpi eq, %c16_i32, %c0_i32 : i32
    %c1_i32 = arith.constant 1 : i32
    %3 = arith.select %2, %c1_i32, %c16_i32 : i32
    %4 = vector.broadcast %3 : i32 to vector<1x1x256xi32>
    %5 = arith.remsi %1, %4 : vector<1x1x256xi32>
    %c0_i32_2 = arith.constant 0 : i32
    %6 = vector.broadcast %c0_i32_2 : i32 to vector<1x1x256xi32>
    %7 = arith.cmpi ne, %5, %6 : vector<1x1x256xi32>
    %c0_i32_3 = arith.constant 0 : i32
    %8 = vector.broadcast %c0_i32_3 : i32 to vector<1x1x256xi32>
    %9 = arith.cmpi slt, %5, %8 : vector<1x1x256xi32>
    %c0_i32_4 = arith.constant 0 : i32
    %10 = arith.cmpi slt, %3, %c0_i32_4 : i32
    %11 = vector.broadcast %10 : i1 to vector<1x1x256xi1>
    %12 = vector.broadcast %11 : vector<1x1x256xi1> to vector<1x1x256xi1>
    %13 = arith.xori %9, %12 : vector<1x1x256xi1>
    %14 = arith.andi %13, %7 : vector<1x1x256xi1>
    %15 = vector.broadcast %3 : i32 to vector<1x1x256xi32>
    %16 = arith.addi %5, %15 : vector<1x1x256xi32>
    %17 = arith.select %14, %16, %5 : vector<1x1x256xi1>, vector<1x1x256xi32>
    %c-2_i32 = arith.constant -2 : i32
    %18 = vector.broadcast %c-2_i32 : i32 to vector<1x1x256xi32>
    %19 = arith.addi %17, %18 : vector<1x1x256xi32>
    %c0_i32_5 = arith.constant 0 : i32
    %20 = vector.broadcast %c0_i32_5 : i32 to vector<1x1x256xi32>
    %21 = arith.cmpi sge, %19, %20 : vector<1x1x256xi32>
    %c-2_i32_6 = arith.constant -2 : i32
    %22 = vector.broadcast %c-2_i32_6 : i32 to vector<1x1x256xi32>
    %23 = arith.addi %17, %22 : vector<1x1x256xi32>
    %c16_i32_7 = arith.constant 16 : i32
    %24 = vector.broadcast %c16_i32_7 : i32 to vector<1x1x256xi32>
    %25 = arith.cmpi slt, %23, %24 : vector<1x1x256xi32>
    %26 = arith.andi %21, %25 : vector<1x1x256xi1>
    %c-1_i32 = arith.constant -1 : i32
    %27 = vector.broadcast %c-1_i32 : i32 to vector<1x1x256xi32>
    %28 = arith.addi %17, %27 : vector<1x1x256xi32>
    %c0_i32_8 = arith.constant 0 : i32
    %29 = vector.broadcast %c0_i32_8 : i32 to vector<1x1x256xi32>
    %30 = arith.cmpi sge, %28, %29 : vector<1x1x256xi32>
    %c-1_i32_9 = arith.constant -1 : i32
    %31 = vector.broadcast %c-1_i32_9 : i32 to vector<1x1x256xi32>
    %32 = arith.addi %17, %31 : vector<1x1x256xi32>
    %c16_i32_10 = arith.constant 16 : i32
    %33 = vector.broadcast %c16_i32_10 : i32 to vector<1x1x256xi32>
    %34 = arith.cmpi slt, %32, %33 : vector<1x1x256xi32>
    %35 = arith.andi %30, %34 : vector<1x1x256xi1>
    %c1_i32_11 = arith.constant 1 : i32
    %36 = vector.broadcast %c1_i32_11 : i32 to vector<1x1x256xi32>
    %37 = arith.addi %17, %36 : vector<1x1x256xi32>
    %c0_i32_12 = arith.constant 0 : i32
    %38 = vector.broadcast %c0_i32_12 : i32 to vector<1x1x256xi32>
    %39 = arith.cmpi sge, %37, %38 : vector<1x1x256xi32>
    %c1_i32_13 = arith.constant 1 : i32
    %40 = vector.broadcast %c1_i32_13 : i32 to vector<1x1x256xi32>
    %41 = arith.addi %17, %40 : vector<1x1x256xi32>
    %c16_i32_14 = arith.constant 16 : i32
    %42 = vector.broadcast %c16_i32_14 : i32 to vector<1x1x256xi32>
    %43 = arith.cmpi slt, %41, %42 : vector<1x1x256xi32>
    %44 = arith.andi %39, %43 : vector<1x1x256xi1>
    %c2_i32 = arith.constant 2 : i32
    %45 = vector.broadcast %c2_i32 : i32 to vector<1x1x256xi32>
    %46 = arith.addi %17, %45 : vector<1x1x256xi32>
    %c0_i32_15 = arith.constant 0 : i32
    %47 = vector.broadcast %c0_i32_15 : i32 to vector<1x1x256xi32>
    %48 = arith.cmpi sge, %46, %47 : vector<1x1x256xi32>
    %c2_i32_16 = arith.constant 2 : i32
    %49 = vector.broadcast %c2_i32_16 : i32 to vector<1x1x256xi32>
    %50 = arith.addi %17, %49 : vector<1x1x256xi32>
    %c16_i32_17 = arith.constant 16 : i32
    %51 = vector.broadcast %c16_i32_17 : i32 to vector<1x1x256xi32>
    %52 = arith.cmpi slt, %50, %51 : vector<1x1x256xi32>
    %53 = arith.andi %48, %52 : vector<1x1x256xi1>
    %54 = arith.truncf %0 : vector<1x4x256xf32> to vector<1x4x256xbf16>
    %c0_18 = arith.constant 0 : index
    %c0_19 = arith.constant 0 : index
    %55 = vector.load %arg2[%c0_18, %c0_19] : memref<12x4xbf16, #tpu.memory_space<vmem>>, vector<12x4xbf16>
    %56 = vector.shape_cast %54 : vector<1x4x256xbf16> to vector<4x256xbf16>
    %cst = arith.constant dense<0.000000e+00> : vector<12x256xf32>
    %57 = tpu.matmul %55, %56, %cst {dimension_numbers = #tpu.dot_dimension_numbers<[1], [0], [0], [1], [0, 0, 1, 1], [], []>} : vector<12x4xbf16>, vector<4x256xbf16>, vector<12x256xf32> -> vector<12x256xf32>
    %58 = vector.shape_cast %57 : vector<12x256xf32> to vector<1x12x256xf32>
    %c0_20 = arith.constant 0 : index
    %c0_21 = arith.constant 0 : index
    %59 = vector.load %arg3[%c0_20, %c0_21] : memref<12x1xf32, #tpu.memory_space<vmem>>, vector<12x1xf32>
    %60 = vector.shape_cast %59 : vector<12x1xf32> to vector<1x12x1xf32>
    %61 = vector.broadcast %60 : vector<1x12x1xf32> to vector<1x12x256xf32>
    %62 = arith.addf %58, %61 : vector<1x12x256xf32>
    %63 = vector.extract_strided_slice %62 {offsets = [0, 0, 0], sizes = [1, 8, 256], strides = [1, 1, 1]} : vector<1x12x256xf32> to vector<1x8x256xf32>
    %64 = arith.truncf %63 : vector<1x8x256xf32> to vector<1x8x256xbf16>
    %65 = vector.extract_strided_slice %62 {offsets = [0, 8, 0], sizes = [1, 4, 256], strides = [1, 1, 1]} : vector<1x12x256xf32> to vector<1x4x256xf32>
    %66 = arith.truncf %65 : vector<1x4x256xf32> to vector<1x4x256xbf16>
    %cst_22 = arith.constant -1.000000e+30 : f32
    %67 = vector.broadcast %cst_22 : f32 to vector<1x4x1xf32>
    %68 = vector.extract_strided_slice %0 {offsets = [0, 0, 0], sizes = [1, 4, 255], strides = [1, 1, 1]} : vector<1x4x256xf32> to vector<1x4x255xf32>
    %69 = tpu.concatenate %67, %68 in 2 : vector<1x4x1xf32>, vector<1x4x255xf32> -> vector<1x4x256xf32>
    %cst_23 = arith.constant -1.000000e+30 : f32
    %70 = vector.shape_cast %35 : vector<1x1x256xi1> to vector<1x1x256xi1>
    %71 = vector.broadcast %70 : vector<1x1x256xi1> to vector<1x4x256xi1>
    %72 = vector.broadcast %cst_23 : f32 to vector<1x4x256xf32>
    %73 = arith.select %71, %69, %72 : vector<1x4x256xi1>, vector<1x4x256xf32>
    %74 = arith.maximumf %73, %0 : vector<1x4x256xf32>
    %cst_24 = arith.constant -1.000000e+30 : f32
    %75 = vector.broadcast %cst_24 : f32 to vector<1x4x1xf32>
    %76 = vector.extract_strided_slice %0 {offsets = [0, 0, 1], sizes = [1, 4, 255], strides = [1, 1, 1]} : vector<1x4x256xf32> to vector<1x4x255xf32>
    %77 = tpu.concatenate %76, %75 in 2 : vector<1x4x255xf32>, vector<1x4x1xf32> -> vector<1x4x256xf32>
    %cst_25 = arith.constant -1.000000e+30 : f32
    %78 = vector.shape_cast %44 : vector<1x1x256xi1> to vector<1x1x256xi1>
    %79 = vector.broadcast %78 : vector<1x1x256xi1> to vector<1x4x256xi1>
    %80 = vector.broadcast %cst_25 : f32 to vector<1x4x256xf32>
    %81 = arith.select %79, %77, %80 : vector<1x4x256xi1>, vector<1x4x256xf32>
    %82 = arith.maximumf %74, %81 : vector<1x4x256xf32>
    %cst_26 = arith.constant -1.000000e+30 : f32
    %83 = vector.broadcast %cst_26 : f32 to vector<1x4x16xf32>
    %84 = vector.extract_strided_slice %82 {offsets = [0, 0, 0], sizes = [1, 4, 240], strides = [1, 1, 1]} : vector<1x4x256xf32> to vector<1x4x240xf32>
    %85 = tpu.concatenate %83, %84 in 2 : vector<1x4x16xf32>, vector<1x4x240xf32> -> vector<1x4x256xf32>
    %86 = arith.maximumf %85, %82 : vector<1x4x256xf32>
    %cst_27 = arith.constant -1.000000e+30 : f32
    %87 = vector.broadcast %cst_27 : f32 to vector<1x4x16xf32>
    %88 = vector.extract_strided_slice %82 {offsets = [0, 0, 16], sizes = [1, 4, 240], strides = [1, 1, 1]} : vector<1x4x256xf32> to vector<1x4x240xf32>
    %89 = tpu.concatenate %88, %87 in 2 : vector<1x4x240xf32>, vector<1x4x16xf32> -> vector<1x4x256xf32>
    %90 = arith.maximumf %86, %89 : vector<1x4x256xf32>
    %cst_28 = arith.constant 0.000000e+00 : bf16
    %91 = vector.broadcast %cst_28 : bf16 to vector<1x8x17xbf16>
    %92 = vector.extract_strided_slice %64 {offsets = [0, 0, 0], sizes = [1, 8, 239], strides = [1, 1, 1]} : vector<1x8x256xbf16> to vector<1x8x239xbf16>
    %93 = tpu.concatenate %91, %92 in 2 : vector<1x8x17xbf16>, vector<1x8x239xbf16> -> vector<1x8x256xbf16>
    %cst_29 = arith.constant 0.000000e+00 : bf16
    %94 = vector.shape_cast %35 : vector<1x1x256xi1> to vector<1x1x256xi1>
    %95 = vector.broadcast %94 : vector<1x1x256xi1> to vector<1x8x256xi1>
    %96 = vector.broadcast %cst_29 : bf16 to vector<1x8x256xbf16>
    %97 = arith.select %95, %93, %96 : vector<1x8x256xi1>, vector<1x8x256xbf16>
    %cst_30 = arith.constant 0.000000e+00 : bf16
    %98 = vector.broadcast %cst_30 : bf16 to vector<1x8x16xbf16>
    %99 = vector.extract_strided_slice %64 {offsets = [0, 0, 0], sizes = [1, 8, 240], strides = [1, 1, 1]} : vector<1x8x256xbf16> to vector<1x8x240xbf16>
    %100 = tpu.concatenate %98, %99 in 2 : vector<1x8x16xbf16>, vector<1x8x240xbf16> -> vector<1x8x256xbf16>
    %cst_31 = arith.constant 0.000000e+00 : bf16
    %101 = vector.broadcast %cst_31 : bf16 to vector<1x8x15xbf16>
    %102 = vector.extract_strided_slice %64 {offsets = [0, 0, 0], sizes = [1, 8, 241], strides = [1, 1, 1]} : vector<1x8x256xbf16> to vector<1x8x241xbf16>
    %103 = tpu.concatenate %101, %102 in 2 : vector<1x8x15xbf16>, vector<1x8x241xbf16> -> vector<1x8x256xbf16>
    %cst_32 = arith.constant 0.000000e+00 : bf16
    %104 = vector.shape_cast %44 : vector<1x1x256xi1> to vector<1x1x256xi1>
    %105 = vector.broadcast %104 : vector<1x1x256xi1> to vector<1x8x256xi1>
    %106 = vector.broadcast %cst_32 : bf16 to vector<1x8x256xbf16>
    %107 = arith.select %105, %103, %106 : vector<1x8x256xi1>, vector<1x8x256xbf16>
    %cst_33 = arith.constant 0.000000e+00 : bf16
    %108 = vector.broadcast %cst_33 : bf16 to vector<1x8x1xbf16>
    %109 = vector.extract_strided_slice %64 {offsets = [0, 0, 0], sizes = [1, 8, 255], strides = [1, 1, 1]} : vector<1x8x256xbf16> to vector<1x8x255xbf16>
    %110 = tpu.concatenate %108, %109 in 2 : vector<1x8x1xbf16>, vector<1x8x255xbf16> -> vector<1x8x256xbf16>
    %cst_34 = arith.constant 0.000000e+00 : bf16
    %111 = vector.shape_cast %35 : vector<1x1x256xi1> to vector<1x1x256xi1>
    %112 = vector.broadcast %111 : vector<1x1x256xi1> to vector<1x8x256xi1>
    %113 = vector.broadcast %cst_34 : bf16 to vector<1x8x256xbf16>
    %114 = arith.select %112, %110, %113 : vector<1x8x256xi1>, vector<1x8x256xbf16>
    %cst_35 = arith.constant 0.000000e+00 : bf16
    %115 = vector.broadcast %cst_35 : bf16 to vector<1x8x1xbf16>
    %116 = vector.extract_strided_slice %64 {offsets = [0, 0, 1], sizes = [1, 8, 255], strides = [1, 1, 1]} : vector<1x8x256xbf16> to vector<1x8x255xbf16>
    %117 = tpu.concatenate %116, %115 in 2 : vector<1x8x255xbf16>, vector<1x8x1xbf16> -> vector<1x8x256xbf16>
    %cst_36 = arith.constant 0.000000e+00 : bf16
    %118 = vector.shape_cast %44 : vector<1x1x256xi1> to vector<1x1x256xi1>
    %119 = vector.broadcast %118 : vector<1x1x256xi1> to vector<1x8x256xi1>
    %120 = vector.broadcast %cst_36 : bf16 to vector<1x8x256xbf16>
    %121 = arith.select %119, %117, %120 : vector<1x8x256xi1>, vector<1x8x256xbf16>
    %cst_37 = arith.constant 0.000000e+00 : bf16
    %122 = vector.broadcast %cst_37 : bf16 to vector<1x8x15xbf16>
    %123 = vector.extract_strided_slice %64 {offsets = [0, 0, 15], sizes = [1, 8, 241], strides = [1, 1, 1]} : vector<1x8x256xbf16> to vector<1x8x241xbf16>
    %124 = tpu.concatenate %123, %122 in 2 : vector<1x8x241xbf16>, vector<1x8x15xbf16> -> vector<1x8x256xbf16>
    %cst_38 = arith.constant 0.000000e+00 : bf16
    %125 = vector.shape_cast %35 : vector<1x1x256xi1> to vector<1x1x256xi1>
    %126 = vector.broadcast %125 : vector<1x1x256xi1> to vector<1x8x256xi1>
    %127 = vector.broadcast %cst_38 : bf16 to vector<1x8x256xbf16>
    %128 = arith.select %126, %124, %127 : vector<1x8x256xi1>, vector<1x8x256xbf16>
    %cst_39 = arith.constant 0.000000e+00 : bf16
    %129 = vector.broadcast %cst_39 : bf16 to vector<1x8x16xbf16>
    %130 = vector.extract_strided_slice %64 {offsets = [0, 0, 16], sizes = [1, 8, 240], strides = [1, 1, 1]} : vector<1x8x256xbf16> to vector<1x8x240xbf16>
    %131 = tpu.concatenate %130, %129 in 2 : vector<1x8x240xbf16>, vector<1x8x16xbf16> -> vector<1x8x256xbf16>
    %cst_40 = arith.constant 0.000000e+00 : bf16
    %132 = vector.broadcast %cst_40 : bf16 to vector<1x8x17xbf16>
    %133 = vector.extract_strided_slice %64 {offsets = [0, 0, 17], sizes = [1, 8, 239], strides = [1, 1, 1]} : vector<1x8x256xbf16> to vector<1x8x239xbf16>
    %134 = tpu.concatenate %133, %132 in 2 : vector<1x8x239xbf16>, vector<1x8x17xbf16> -> vector<1x8x256xbf16>
    %cst_41 = arith.constant 0.000000e+00 : bf16
    %135 = vector.shape_cast %44 : vector<1x1x256xi1> to vector<1x1x256xi1>
    %136 = vector.broadcast %135 : vector<1x1x256xi1> to vector<1x8x256xi1>
    %137 = vector.broadcast %cst_41 : bf16 to vector<1x8x256xbf16>
    %138 = arith.select %136, %134, %137 : vector<1x8x256xi1>, vector<1x8x256xbf16>
    %cst_42 = arith.constant 0.000000e+00 : bf16
    %139 = vector.broadcast %cst_42 : bf16 to vector<1x4x34xbf16>
    %140 = vector.extract_strided_slice %66 {offsets = [0, 0, 0], sizes = [1, 4, 222], strides = [1, 1, 1]} : vector<1x4x256xbf16> to vector<1x4x222xbf16>
    %141 = tpu.concatenate %139, %140 in 2 : vector<1x4x34xbf16>, vector<1x4x222xbf16> -> vector<1x4x256xbf16>
    %cst_43 = arith.constant 0.000000e+00 : bf16
    %142 = vector.shape_cast %26 : vector<1x1x256xi1> to vector<1x1x256xi1>
    %143 = vector.broadcast %142 : vector<1x1x256xi1> to vector<1x4x256xi1>
    %144 = vector.broadcast %cst_43 : bf16 to vector<1x4x256xbf16>
    %145 = arith.select %143, %141, %144 : vector<1x4x256xi1>, vector<1x4x256xbf16>
    %cst_44 = arith.constant 0.000000e+00 : bf16
    %146 = vector.broadcast %cst_44 : bf16 to vector<1x4x33xbf16>
    %147 = vector.extract_strided_slice %66 {offsets = [0, 0, 0], sizes = [1, 4, 223], strides = [1, 1, 1]} : vector<1x4x256xbf16> to vector<1x4x223xbf16>
    %148 = tpu.concatenate %146, %147 in 2 : vector<1x4x33xbf16>, vector<1x4x223xbf16> -> vector<1x4x256xbf16>
    %cst_45 = arith.constant 0.000000e+00 : bf16
    %149 = vector.shape_cast %35 : vector<1x1x256xi1> to vector<1x1x256xi1>
    %150 = vector.broadcast %149 : vector<1x1x256xi1> to vector<1x4x256xi1>
    %151 = vector.broadcast %cst_45 : bf16 to vector<1x4x256xbf16>
    %152 = arith.select %150, %148, %151 : vector<1x4x256xi1>, vector<1x4x256xbf16>
    %cst_46 = arith.constant 0.000000e+00 : bf16
    %153 = vector.broadcast %cst_46 : bf16 to vector<1x4x32xbf16>
    %154 = vector.extract_strided_slice %66 {offsets = [0, 0, 0], sizes = [1, 4, 224], strides = [1, 1, 1]} : vector<1x4x256xbf16> to vector<1x4x224xbf16>
    %155 = tpu.concatenate %153, %154 in 2 : vector<1x4x32xbf16>, vector<1x4x224xbf16> -> vector<1x4x256xbf16>
    %cst_47 = arith.constant 0.000000e+00 : bf16
    %156 = vector.broadcast %cst_47 : bf16 to vector<1x4x31xbf16>
    %157 = vector.extract_strided_slice %66 {offsets = [0, 0, 0], sizes = [1, 4, 225], strides = [1, 1, 1]} : vector<1x4x256xbf16> to vector<1x4x225xbf16>
    %158 = tpu.concatenate %156, %157 in 2 : vector<1x4x31xbf16>, vector<1x4x225xbf16> -> vector<1x4x256xbf16>
    %cst_48 = arith.constant 0.000000e+00 : bf16
    %159 = vector.shape_cast %44 : vector<1x1x256xi1> to vector<1x1x256xi1>
    %160 = vector.broadcast %159 : vector<1x1x256xi1> to vector<1x4x256xi1>
    %161 = vector.broadcast %cst_48 : bf16 to vector<1x4x256xbf16>
    %162 = arith.select %160, %158, %161 : vector<1x4x256xi1>, vector<1x4x256xbf16>
    %cst_49 = arith.constant 0.000000e+00 : bf16
    %163 = vector.broadcast %cst_49 : bf16 to vector<1x4x30xbf16>
    %164 = vector.extract_strided_slice %66 {offsets = [0, 0, 0], sizes = [1, 4, 226], strides = [1, 1, 1]} : vector<1x4x256xbf16> to vector<1x4x226xbf16>
    %165 = tpu.concatenate %163, %164 in 2 : vector<1x4x30xbf16>, vector<1x4x226xbf16> -> vector<1x4x256xbf16>
    %cst_50 = arith.constant 0.000000e+00 : bf16
    %166 = vector.shape_cast %53 : vector<1x1x256xi1> to vector<1x1x256xi1>
    %167 = vector.broadcast %166 : vector<1x1x256xi1> to vector<1x4x256xi1>
    %168 = vector.broadcast %cst_50 : bf16 to vector<1x4x256xbf16>
    %169 = arith.select %167, %165, %168 : vector<1x4x256xi1>, vector<1x4x256xbf16>
    %cst_51 = arith.constant 0.000000e+00 : bf16
    %170 = vector.broadcast %cst_51 : bf16 to vector<1x4x18xbf16>
    %171 = vector.extract_strided_slice %66 {offsets = [0, 0, 0], sizes = [1, 4, 238], strides = [1, 1, 1]} : vector<1x4x256xbf16> to vector<1x4x238xbf16>
    %172 = tpu.concatenate %170, %171 in 2 : vector<1x4x18xbf16>, vector<1x4x238xbf16> -> vector<1x4x256xbf16>
    %cst_52 = arith.constant 0.000000e+00 : bf16
    %173 = vector.shape_cast %26 : vector<1x1x256xi1> to vector<1x1x256xi1>
    %174 = vector.broadcast %173 : vector<1x1x256xi1> to vector<1x4x256xi1>
    %175 = vector.broadcast %cst_52 : bf16 to vector<1x4x256xbf16>
    %176 = arith.select %174, %172, %175 : vector<1x4x256xi1>, vector<1x4x256xbf16>
    %cst_53 = arith.constant 0.000000e+00 : bf16
    %177 = vector.broadcast %cst_53 : bf16 to vector<1x4x17xbf16>
    %178 = vector.extract_strided_slice %66 {offsets = [0, 0, 0], sizes = [1, 4, 239], strides = [1, 1, 1]} : vector<1x4x256xbf16> to vector<1x4x239xbf16>
    %179 = tpu.concatenate %177, %178 in 2 : vector<1x4x17xbf16>, vector<1x4x239xbf16> -> vector<1x4x256xbf16>
    %cst_54 = arith.constant 0.000000e+00 : bf16
    %180 = vector.shape_cast %35 : vector<1x1x256xi1> to vector<1x1x256xi1>
    %181 = vector.broadcast %180 : vector<1x1x256xi1> to vector<1x4x256xi1>
    %182 = vector.broadcast %cst_54 : bf16 to vector<1x4x256xbf16>
    %183 = arith.select %181, %179, %182 : vector<1x4x256xi1>, vector<1x4x256xbf16>
    %cst_55 = arith.constant 0.000000e+00 : bf16
    %184 = vector.broadcast %cst_55 : bf16 to vector<1x4x16xbf16>
    %185 = vector.extract_strided_slice %66 {offsets = [0, 0, 0], sizes = [1, 4, 240], strides = [1, 1, 1]} : vector<1x4x256xbf16> to vector<1x4x240xbf16>
    %186 = tpu.concatenate %184, %185 in 2 : vector<1x4x16xbf16>, vector<1x4x240xbf16> -> vector<1x4x256xbf16>
    %cst_56 = arith.constant 0.000000e+00 : bf16
    %187 = vector.broadcast %cst_56 : bf16 to vector<1x4x15xbf16>
    %188 = vector.extract_strided_slice %66 {offsets = [0, 0, 0], sizes = [1, 4, 241], strides = [1, 1, 1]} : vector<1x4x256xbf16> to vector<1x4x241xbf16>
    %189 = tpu.concatenate %187, %188 in 2 : vector<1x4x15xbf16>, vector<1x4x241xbf16> -> vector<1x4x256xbf16>
    %cst_57 = arith.constant 0.000000e+00 : bf16
    %190 = vector.shape_cast %44 : vector<1x1x256xi1> to vector<1x1x256xi1>
    %191 = vector.broadcast %190 : vector<1x1x256xi1> to vector<1x4x256xi1>
    %192 = vector.broadcast %cst_57 : bf16 to vector<1x4x256xbf16>
    %193 = arith.select %191, %189, %192 : vector<1x4x256xi1>, vector<1x4x256xbf16>
    %cst_58 = arith.constant 0.000000e+00 : bf16
    %194 = vector.broadcast %cst_58 : bf16 to vector<1x4x14xbf16>
    %195 = vector.extract_strided_slice %66 {offsets = [0, 0, 0], sizes = [1, 4, 242], strides = [1, 1, 1]} : vector<1x4x256xbf16> to vector<1x4x242xbf16>
    %196 = tpu.concatenate %194, %195 in 2 : vector<1x4x14xbf16>, vector<1x4x242xbf16> -> vector<1x4x256xbf16>
    %cst_59 = arith.constant 0.000000e+00 : bf16
    %197 = vector.shape_cast %53 : vector<1x1x256xi1> to vector<1x1x256xi1>
    %198 = vector.broadcast %197 : vector<1x1x256xi1> to vector<1x4x256xi1>
    %199 = vector.broadcast %cst_59 : bf16 to vector<1x4x256xbf16>
    %200 = arith.select %198, %196, %199 : vector<1x4x256xi1>, vector<1x4x256xbf16>
    %cst_60 = arith.constant 0.000000e+00 : bf16
    %201 = vector.broadcast %cst_60 : bf16 to vector<1x4x2xbf16>
    %202 = vector.extract_strided_slice %66 {offsets = [0, 0, 0], sizes = [1, 4, 254], strides = [1, 1, 1]} : vector<1x4x256xbf16> to vector<1x4x254xbf16>
    %203 = tpu.concatenate %201, %202 in 2 : vector<1x4x2xbf16>, vector<1x4x254xbf16> -> vector<1x4x256xbf16>
    %cst_61 = arith.constant 0.000000e+00 : bf16
    %204 = vector.shape_cast %26 : vector<1x1x256xi1> to vector<1x1x256xi1>
    %205 = vector.broadcast %204 : vector<1x1x256xi1> to vector<1x4x256xi1>
    %206 = vector.broadcast %cst_61 : bf16 to vector<1x4x256xbf16>
    %207 = arith.select %205, %203, %206 : vector<1x4x256xi1>, vector<1x4x256xbf16>
    %cst_62 = arith.constant 0.000000e+00 : bf16
    %208 = vector.broadcast %cst_62 : bf16 to vector<1x4x1xbf16>
    %209 = vector.extract_strided_slice %66 {offsets = [0, 0, 0], sizes = [1, 4, 255], strides = [1, 1, 1]} : vector<1x4x256xbf16> to vector<1x4x255xbf16>
    %210 = tpu.concatenate %208, %209 in 2 : vector<1x4x1xbf16>, vector<1x4x255xbf16> -> vector<1x4x256xbf16>
    %cst_63 = arith.constant 0.000000e+00 : bf16
    %211 = vector.shape_cast %35 : vector<1x1x256xi1> to vector<1x1x256xi1>
    %212 = vector.broadcast %211 : vector<1x1x256xi1> to vector<1x4x256xi1>
    %213 = vector.broadcast %cst_63 : bf16 to vector<1x4x256xbf16>
    %214 = arith.select %212, %210, %213 : vector<1x4x256xi1>, vector<1x4x256xbf16>
    %cst_64 = arith.constant 0.000000e+00 : bf16
    %215 = vector.broadcast %cst_64 : bf16 to vector<1x4x1xbf16>
    %216 = vector.extract_strided_slice %66 {offsets = [0, 0, 1], sizes = [1, 4, 255], strides = [1, 1, 1]} : vector<1x4x256xbf16> to vector<1x4x255xbf16>
    %217 = tpu.concatenate %216, %215 in 2 : vector<1x4x255xbf16>, vector<1x4x1xbf16> -> vector<1x4x256xbf16>
    %cst_65 = arith.constant 0.000000e+00 : bf16
    %218 = vector.shape_cast %44 : vector<1x1x256xi1> to vector<1x1x256xi1>
    %219 = vector.broadcast %218 : vector<1x1x256xi1> to vector<1x4x256xi1>
    %220 = vector.broadcast %cst_65 : bf16 to vector<1x4x256xbf16>
    %221 = arith.select %219, %217, %220 : vector<1x4x256xi1>, vector<1x4x256xbf16>
    %cst_66 = arith.constant 0.000000e+00 : bf16
    %222 = vector.broadcast %cst_66 : bf16 to vector<1x4x2xbf16>
    %223 = vector.extract_strided_slice %66 {offsets = [0, 0, 2], sizes = [1, 4, 254], strides = [1, 1, 1]} : vector<1x4x256xbf16> to vector<1x4x254xbf16>
    %224 = tpu.concatenate %223, %222 in 2 : vector<1x4x254xbf16>, vector<1x4x2xbf16> -> vector<1x4x256xbf16>
    %cst_67 = arith.constant 0.000000e+00 : bf16
    %225 = vector.shape_cast %53 : vector<1x1x256xi1> to vector<1x1x256xi1>
    %226 = vector.broadcast %225 : vector<1x1x256xi1> to vector<1x4x256xi1>
    %227 = vector.broadcast %cst_67 : bf16 to vector<1x4x256xbf16>
    %228 = arith.select %226, %224, %227 : vector<1x4x256xi1>, vector<1x4x256xbf16>
    %cst_68 = arith.constant 0.000000e+00 : bf16
    %229 = vector.broadcast %cst_68 : bf16 to vector<1x4x14xbf16>
    %230 = vector.extract_strided_slice %66 {offsets = [0, 0, 14], sizes = [1, 4, 242], strides = [1, 1, 1]} : vector<1x4x256xbf16> to vector<1x4x242xbf16>
    %231 = tpu.concatenate %230, %229 in 2 : vector<1x4x242xbf16>, vector<1x4x14xbf16> -> vector<1x4x256xbf16>
    %cst_69 = arith.constant 0.000000e+00 : bf16
    %232 = vector.shape_cast %26 : vector<1x1x256xi1> to vector<1x1x256xi1>
    %233 = vector.broadcast %232 : vector<1x1x256xi1> to vector<1x4x256xi1>
    %234 = vector.broadcast %cst_69 : bf16 to vector<1x4x256xbf16>
    %235 = arith.select %233, %231, %234 : vector<1x4x256xi1>, vector<1x4x256xbf16>
    %cst_70 = arith.constant 0.000000e+00 : bf16
    %236 = vector.broadcast %cst_70 : bf16 to vector<1x4x15xbf16>
    %237 = vector.extract_strided_slice %66 {offsets = [0, 0, 15], sizes = [1, 4, 241], strides = [1, 1, 1]} : vector<1x4x256xbf16> to vector<1x4x241xbf16>
    %238 = tpu.concatenate %237, %236 in 2 : vector<1x4x241xbf16>, vector<1x4x15xbf16> -> vector<1x4x256xbf16>
    %cst_71 = arith.constant 0.000000e+00 : bf16
    %239 = vector.shape_cast %35 : vector<1x1x256xi1> to vector<1x1x256xi1>
    %240 = vector.broadcast %239 : vector<1x1x256xi1> to vector<1x4x256xi1>
    %241 = vector.broadcast %cst_71 : bf16 to vector<1x4x256xbf16>
    %242 = arith.select %240, %238, %241 : vector<1x4x256xi1>, vector<1x4x256xbf16>
    %cst_72 = arith.constant 0.000000e+00 : bf16
    %243 = vector.broadcast %cst_72 : bf16 to vector<1x4x16xbf16>
    %244 = vector.extract_strided_slice %66 {offsets = [0, 0, 16], sizes = [1, 4, 240], strides = [1, 1, 1]} : vector<1x4x256xbf16> to vector<1x4x240xbf16>
    %245 = tpu.concatenate %244, %243 in 2 : vector<1x4x240xbf16>, vector<1x4x16xbf16> -> vector<1x4x256xbf16>
    %cst_73 = arith.constant 0.000000e+00 : bf16
    %246 = vector.broadcast %cst_73 : bf16 to vector<1x4x17xbf16>
    %247 = vector.extract_strided_slice %66 {offsets = [0, 0, 17], sizes = [1, 4, 239], strides = [1, 1, 1]} : vector<1x4x256xbf16> to vector<1x4x239xbf16>
    %248 = tpu.concatenate %247, %246 in 2 : vector<1x4x239xbf16>, vector<1x4x17xbf16> -> vector<1x4x256xbf16>
    %cst_74 = arith.constant 0.000000e+00 : bf16
    %249 = vector.shape_cast %44 : vector<1x1x256xi1> to vector<1x1x256xi1>
    %250 = vector.broadcast %249 : vector<1x1x256xi1> to vector<1x4x256xi1>
    %251 = vector.broadcast %cst_74 : bf16 to vector<1x4x256xbf16>
    %252 = arith.select %250, %248, %251 : vector<1x4x256xi1>, vector<1x4x256xbf16>
    %cst_75 = arith.constant 0.000000e+00 : bf16
    %253 = vector.broadcast %cst_75 : bf16 to vector<1x4x18xbf16>
    %254 = vector.extract_strided_slice %66 {offsets = [0, 0, 18], sizes = [1, 4, 238], strides = [1, 1, 1]} : vector<1x4x256xbf16> to vector<1x4x238xbf16>
    %255 = tpu.concatenate %254, %253 in 2 : vector<1x4x238xbf16>, vector<1x4x18xbf16> -> vector<1x4x256xbf16>
    %cst_76 = arith.constant 0.000000e+00 : bf16
    %256 = vector.shape_cast %53 : vector<1x1x256xi1> to vector<1x1x256xi1>
    %257 = vector.broadcast %256 : vector<1x1x256xi1> to vector<1x4x256xi1>
    %258 = vector.broadcast %cst_76 : bf16 to vector<1x4x256xbf16>
    %259 = arith.select %257, %255, %258 : vector<1x4x256xi1>, vector<1x4x256xbf16>
    %cst_77 = arith.constant 0.000000e+00 : bf16
    %260 = vector.broadcast %cst_77 : bf16 to vector<1x4x30xbf16>
    %261 = vector.extract_strided_slice %66 {offsets = [0, 0, 30], sizes = [1, 4, 226], strides = [1, 1, 1]} : vector<1x4x256xbf16> to vector<1x4x226xbf16>
    %262 = tpu.concatenate %261, %260 in 2 : vector<1x4x226xbf16>, vector<1x4x30xbf16> -> vector<1x4x256xbf16>
    %cst_78 = arith.constant 0.000000e+00 : bf16
    %263 = vector.shape_cast %26 : vector<1x1x256xi1> to vector<1x1x256xi1>
    %264 = vector.broadcast %263 : vector<1x1x256xi1> to vector<1x4x256xi1>
    %265 = vector.broadcast %cst_78 : bf16 to vector<1x4x256xbf16>
    %266 = arith.select %264, %262, %265 : vector<1x4x256xi1>, vector<1x4x256xbf16>
    %cst_79 = arith.constant 0.000000e+00 : bf16
    %267 = vector.broadcast %cst_79 : bf16 to vector<1x4x31xbf16>
    %268 = vector.extract_strided_slice %66 {offsets = [0, 0, 31], sizes = [1, 4, 225], strides = [1, 1, 1]} : vector<1x4x256xbf16> to vector<1x4x225xbf16>
    %269 = tpu.concatenate %268, %267 in 2 : vector<1x4x225xbf16>, vector<1x4x31xbf16> -> vector<1x4x256xbf16>
    %cst_80 = arith.constant 0.000000e+00 : bf16
    %270 = vector.shape_cast %35 : vector<1x1x256xi1> to vector<1x1x256xi1>
    %271 = vector.broadcast %270 : vector<1x1x256xi1> to vector<1x4x256xi1>
    %272 = vector.broadcast %cst_80 : bf16 to vector<1x4x256xbf16>
    %273 = arith.select %271, %269, %272 : vector<1x4x256xi1>, vector<1x4x256xbf16>
    %cst_81 = arith.constant 0.000000e+00 : bf16
    %274 = vector.broadcast %cst_81 : bf16 to vector<1x4x32xbf16>
    %275 = vector.extract_strided_slice %66 {offsets = [0, 0, 32], sizes = [1, 4, 224], strides = [1, 1, 1]} : vector<1x4x256xbf16> to vector<1x4x224xbf16>
    %276 = tpu.concatenate %275, %274 in 2 : vector<1x4x224xbf16>, vector<1x4x32xbf16> -> vector<1x4x256xbf16>
    %cst_82 = arith.constant 0.000000e+00 : bf16
    %277 = vector.broadcast %cst_82 : bf16 to vector<1x4x33xbf16>
    %278 = vector.extract_strided_slice %66 {offsets = [0, 0, 33], sizes = [1, 4, 223], strides = [1, 1, 1]} : vector<1x4x256xbf16> to vector<1x4x223xbf16>
    %279 = tpu.concatenate %278, %277 in 2 : vector<1x4x223xbf16>, vector<1x4x33xbf16> -> vector<1x4x256xbf16>
    %cst_83 = arith.constant 0.000000e+00 : bf16
    %280 = vector.shape_cast %44 : vector<1x1x256xi1> to vector<1x1x256xi1>
    %281 = vector.broadcast %280 : vector<1x1x256xi1> to vector<1x4x256xi1>
    %282 = vector.broadcast %cst_83 : bf16 to vector<1x4x256xbf16>
    %283 = arith.select %281, %279, %282 : vector<1x4x256xi1>, vector<1x4x256xbf16>
    %cst_84 = arith.constant 0.000000e+00 : bf16
    %284 = vector.broadcast %cst_84 : bf16 to vector<1x4x34xbf16>
    %285 = vector.extract_strided_slice %66 {offsets = [0, 0, 34], sizes = [1, 4, 222], strides = [1, 1, 1]} : vector<1x4x256xbf16> to vector<1x4x222xbf16>
    %286 = tpu.concatenate %285, %284 in 2 : vector<1x4x222xbf16>, vector<1x4x34xbf16> -> vector<1x4x256xbf16>
    %cst_85 = arith.constant 0.000000e+00 : bf16
    %287 = vector.shape_cast %53 : vector<1x1x256xi1> to vector<1x1x256xi1>
    %288 = vector.broadcast %287 : vector<1x1x256xi1> to vector<1x4x256xi1>
    %289 = vector.broadcast %cst_85 : bf16 to vector<1x4x256xbf16>
    %290 = arith.select %288, %286, %289 : vector<1x4x256xi1>, vector<1x4x256xbf16>
    %291 = arith.truncf %90 : vector<1x4x256xf32> to vector<1x4x256xbf16>
    %292 = tpu.concatenate %54, %97, %100, %107, %114, %64, %121, %128, %131, %138, %145, %152, %155, %162, %169, %176 in 1 : vector<1x4x256xbf16>, vector<1x8x256xbf16>, vector<1x8x256xbf16>, vector<1x8x256xbf16>, vector<1x8x256xbf16>, vector<1x8x256xbf16>, vector<1x8x256xbf16>, vector<1x8x256xbf16>, vector<1x8x256xbf16>, vector<1x8x256xbf16>, vector<1x4x256xbf16>, vector<1x4x256xbf16>, vector<1x4x256xbf16>, vector<1x4x256xbf16>, vector<1x4x256xbf16>, vector<1x4x256xbf16> -> vector<1x100x256xbf16>
    %293 = tpu.concatenate %183, %186, %193, %200, %207, %214, %66, %221, %228, %235, %242, %245, %252, %259, %266, %273 in 1 : vector<1x4x256xbf16>, vector<1x4x256xbf16>, vector<1x4x256xbf16>, vector<1x4x256xbf16>, vector<1x4x256xbf16>, vector<1x4x256xbf16>, vector<1x4x256xbf16>, vector<1x4x256xbf16>, vector<1x4x256xbf16>, vector<1x4x256xbf16>, vector<1x4x256xbf16>, vector<1x4x256xbf16>, vector<1x4x256xbf16>, vector<1x4x256xbf16>, vector<1x4x256xbf16>, vector<1x4x256xbf16> -> vector<1x64x256xbf16>
    %294 = tpu.concatenate %276, %283, %290, %291 in 1 : vector<1x4x256xbf16>, vector<1x4x256xbf16>, vector<1x4x256xbf16>, vector<1x4x256xbf16> -> vector<1x16x256xbf16>
    %295 = tpu.concatenate %292, %293, %294 in 1 : vector<1x100x256xbf16>, vector<1x64x256xbf16>, vector<1x16x256xbf16> -> vector<1x180x256xbf16>
    %c0_86 = arith.constant 0 : index
    %c0_87 = arith.constant 0 : index
    %296 = vector.load %arg4[%c0_86, %c0_87] : memref<40x180xbf16, #tpu.memory_space<vmem>>, vector<40x180xbf16>
    %c0_88 = arith.constant 0 : index
    %c0_89 = arith.constant 0 : index
    %297 = vector.load %arg5[%c0_88, %c0_89] : memref<40x1xf32, #tpu.memory_space<vmem>>, vector<40x1xf32>
    %298 = vector.shape_cast %295 : vector<1x180x256xbf16> to vector<180x256xbf16>
    %cst_90 = arith.constant dense<0.000000e+00> : vector<40x256xf32>
    %299 = tpu.matmul %296, %298, %cst_90 {dimension_numbers = #tpu.dot_dimension_numbers<[1], [0], [0], [1], [0, 0, 1, 1], [], []>} : vector<40x180xbf16>, vector<180x256xbf16>, vector<40x256xf32> -> vector<40x256xf32>
    %300 = vector.broadcast %297 : vector<40x1xf32> to vector<40x256xf32>
    %301 = arith.addf %299, %300 : vector<40x256xf32>
    %cst_91 = arith.constant 0.000000e+00 : f32
    %302 = vector.broadcast %cst_91 : f32 to vector<40x256xf32>
    %303 = arith.maximumf %301, %302 : vector<40x256xf32>
    %c0_92 = arith.constant 0 : index
    %c0_93 = arith.constant 0 : index
    %c0_94 = arith.constant 0 : index
    %304 = vector.load %arg6[%c0_92, %c0_93, %c0_94] : memref<1x40x256xf32, #tpu.memory_space<vmem>>, vector<1x40x256xf32>
    %305 = vector.shape_cast %304 : vector<1x40x256xf32> to vector<40x256xf32>
    %306 = vector.shape_cast %303 : vector<40x256xf32> to vector<1x40x256xf32>
    tpu.vector_store %arg6[%c0_92, %c0_93, %c0_94], %306 {strides = array<i32>} : memref<1x40x256xf32, #tpu.memory_space<vmem>>, vector<1x40x256xf32>,
    return
  }
  func.func @transform_0(%arg0: i32) -> (i32, i32, i32) {
    %c0_i32 = arith.constant 0 : i32
    %c0_i32_0 = arith.constant 0 : i32
    %c0_i32_1 = arith.constant 0 : i32
    return %arg0, %c0_i32, %c0_i32_0 : i32, i32, i32
  }
  func.func @transform_1(%arg0: i32) -> (i32, i32) {
    %c0_i32 = arith.constant 0 : i32
    %c0_i32_0 = arith.constant 0 : i32
    %c0_i32_1 = arith.constant 0 : i32
    return %c0_i32, %c0_i32_0 : i32, i32
  }
  func.func @transform_2(%arg0: i32) -> (i32, i32) {
    %c0_i32 = arith.constant 0 : i32
    %c0_i32_0 = arith.constant 0 : i32
    %c0_i32_1 = arith.constant 0 : i32
    return %c0_i32, %c0_i32_0 : i32, i32
  }
  func.func @transform_3(%arg0: i32) -> (i32, i32) {
    %c0_i32 = arith.constant 0 : i32
    %c0_i32_0 = arith.constant 0 : i32
    %c0_i32_1 = arith.constant 0 : i32
    return %c0_i32, %c0_i32_0 : i32, i32
  }
  func.func @transform_4(%arg0: i32) -> (i32, i32) {
    %c0_i32 = arith.constant 0 : i32
    %c0_i32_0 = arith.constant 0 : i32
    %c0_i32_1 = arith.constant 0 : i32
    return %c0_i32, %c0_i32_0 : i32, i32
  }
  func.func @transform_5(%arg0: i32) -> (i32, i32, i32) {
    %c0_i32 = arith.constant 0 : i32
    %c0_i32_0 = arith.constant 0 : i32
    %c0_i32_1 = arith.constant 0 : i32
    return %arg0, %c0_i32, %c0_i32_0 : i32, i32, i32
  }
}

</mosaic_0001>

<bundles_post_ra>
// kernel: tpu_custom_call.1
= control target key start
LH: loop header
LB: loop body
LE: loop exit
PB: predicated region body
PF: predicated region fallthrough
CT: control target
= control target key end

     0   :  { %10 = vsyncpa [#allocation3], 0  ;;  %s2455_s0 = inlined_call_operand.vmem [shape: f32[2,4,256], index: 0, kind: input, shape index: {}]   ;;  %s2456_s1 = inlined_call_operand.vmem [shape: bf16[12,4], index: 1, kind: input, shape index: {}]   ;;  %s2457_s2 = inlined_call_operand.vmem [shape: f32[12,1], index: 2, kind: input, shape index: {}]   ;;  %s2458_s3 = inlined_call_operand.vmem [shape: bf16[40,180], index: 3, kind: input, shape index: {}]   ;;  %s2459_s4 = inlined_call_operand.vmem [shape: f32[40,1], index: 4, kind: input, shape index: {}]   ;;  %s2460_s5 = inlined_call_operand.hbm [shape: f32[2,40,256], index: 5, kind: output, shape index: {}]  }
   0x1   :  { %12 = vsyncpa [#allocation3 + $0x1], 0  ;;  %s1701_s18 = smov 0   ;;  %s1703_s19 = smov 0  }
   0x2   :  { %s1705_s20 = smov 0   ;;  %s1707_s21 = smov 0  }
   0x3 LB: > { %s1722_s22 = sadd.s32 4294967295, %s1643_s21   ;;  %s1448_s23 = sadd.s32 4294967294, %s1643_s21   ;;  %s1643_s21 = sphi %s1707_s21, %s2540_s21   ;;  %s1639_s20 = sphi %s1705_s20, %s2539_s20   ;;  %s1635_s19 = sphi %s1703_s19, %s2538_s19   ;;  %s1631_s18 = sphi %s1701_s18, %s2537_s18  }
   0x4   : > { %s1726_s24 = sadd.s32 1, %s1643_s21   ;;  %s135_s25 = sadd.s32 1, %s1639_s20 }
   0x5   : > { %s132_s26 = ssub.s32 %s1643_s21, %s1726_s24  ;;  %p145_p0 = scmp.ne.s32.totalorder %s1639_s20, %s1635_s19 }
   0x6   : > { %p133_p1 = scmp.eq.s32.totalorder %s132_s26, 0  ;;  %p146_p2 = scmp.eq.s32.totalorder %s1722_s22, 1 }
   0x7   : > { %p151_p3 = scmp.ne.s32.totalorder %s1635_s19, %s1631_s18  ;;  %p152_p4 = scmp.eq.s32.totalorder %s1448_s23, 1 }
   0x8   : > { %s1737_s27 = scalar_select %p133_p1, %s1639_s20, %s135_s25  }
   0x9   : > { %p1739_p5 = por %p146_p2, %p145_p0  ;;  %p1743_p6 = por %p152_p4, %p151_p3 }
   0xa   : > { %p1451_p7 = scmp.ge.s32.totalorder %s1643_s21, 1  ;;  %p190_p8 = scmp.lt.s32.totalorder %s1643_s21, 3 }
   0xc   : > { %p191_p9 = pnand %p1451_p7, %p190_p8 }
   0xd   : > { %p218_p10 = scmp.lt.s32.totalorder (!%p191_p9), %s1722_s22, 1  ;;  %s1646_s23 = smov (!%p191_p9), 1  }
   0xe   : > { %194 = sbr.rel (%p191_p9) target bundleno = 642 (0x282), region = 40  ;;  %s1647_s25 = smov (!%p191_p9), 127  }
   0xf   : > { %s1648_s26 = smov (!%p191_p9), 112   ;;  %s1649_s30 = smov (!%p191_p9), 16  }
  0x10   : > { %s1650_s6 = smov (!%p191_p9), 111   ;;  %s1651_s7 = smov (!%p191_p9), 113  }
  0x11   : > { %s1652_s8 = smov (!%p191_p9), 15   ;;  %s1655_s11 = smov (!%p191_p9), 14  }
  0x12   : > { %s1656_s12 = smov (!%p191_p9), 31   ;;  %s1658_s14 = smov (!%p191_p9), 32  }
  0x13   : > { %v345_v0 = vld [vmem:[%s2457_s2 + $0x8] sm:$0xf]  ;;  %v344_v1 = vld [vmem:[%s2457_s2] sm:$0xff]  ;;  %s219_s9 = scalar_select %p218_p10, %s1722_s22, 1  ;;  %v1645_v2 = vmov 0   ;;  %vm309_vm0 = vcmask 1041408   ;;  %v227_v24 = vlaneseq }
  0x14   : > { %1558 = vset.pattern.permute.xlu0 %v1645_v2  ;;  %1559 = vset.pattern.permute.xlu1 %v1645_v2  ;;  %v1456_v9 = vld [vmem:[%s2456_s1] sm:$0xf]  ;;  %v1486_v10 = vld [vmem:[%s2456_s1] sm:$0x30]  ;;  %vm305_vm1 = vcmask 31744   ;;  %vm369_vm8 = vcmask 7168  }
  0x15   : > { %353 = vperm.xlu0 %1558, %v345_v0   ;;  %348 = vperm.xlu1 %1559, %v344_v1   ;;  %s1485_s10 = sshll.u32 %s219_s9, 3  ;;  %v1457_v15 = vor.u32 %v1486_v10, %v1456_v9  ;;  %v228_v25 = vand.u32 127, %v227_v24  ;;  %vm394_vm9 = vcmask 1039360   ;;  %s1653_s9 = smov 17   ;;  %vm2463_vm12 = vcmask 908288  }
  0x16   : > { %1580 = vset.pattern.permute.xlu2 %v1645_v2  ;;  %s222_s13 = scalar_lea.vmem %s2455_s0, %s1485_s10  ;;  %s1654_s10 = smov 2   ;;  %vm2468_vm13 = vcmask 130048   ;;  %vm2461_vm14 = vcmask 916480  }
  0x17   : > { %v226_v3 = vld [vmem:[%s222_s13] sm:$0xff]  ;;  %v229_v26 = vadd.s32 128, %v228_v25  ;;  %v1779_v27 = vand.u32 15, %v228_v25  ;;  %s1657_s13 = smov 95   ;;  %s1659_s15 = smov 34  }
  0x18   : > { %287 = vst [vmem:[#allocation1] ss:$2 sm:$0xff] %v226_v3  ;;  %s1660_s16 = smov 30   ;;  %s1661_s17 = smov 94  }
  0x19   : > { %v1781_v28 = vand.u32 15, %v229_v26  ;;  %v262_v29 = vadd.s32 4294967295, %v1779_v27  ;;  %v270_v30 = vadd.s32 1, %v1779_v27 }
  0x1b   : > { %v263_v31 = vadd.s32 4294967295, %v1781_v28  ;;  %v271_v32 = vadd.s32 1, %v1781_v28  ;;  %vm264_vm2 = vcmp.ge.s32.totalorder %v262_v29, 0  ;;  %vm274_vm5 = vcmp.lt.s32.totalorder %v270_v30, 16 }
  0x1d   : > { %vm265_vm3 = vcmp.ge.s32.totalorder %v263_v31, 0  ;;  %vm275_vm6 = vcmp.lt.s32.totalorder %v271_v32, 16 }
  0x1e   : > { %vm1787_vm4 = vmpackc.low %vm265_vm3, %vm264_vm2 }
  0x1f   : > { %v288_v4 = vld.sshfl [vmem:[#allocation1] sm:$0xff pattern:$0x75316420]  ;;  %v289_v5 = vld.sshfl [vmem:[#allocation1 + $0x8] sm:$0xff pattern:$0x75316420]  ;;  %vm1793_vm7 = vmpackc.low %vm275_vm6, %vm274_vm5 }
  0x20   : > { %v292_v6 = vpack.c.bf16 %v289_v5, %v288_v4  ;;  %362 = vst [vmem:[#allocation1] ss:$2 sm:$0xff] %v226_v3 }
  0x22   : > { %v301_v7 = vunpack.c.l.b16 %v292_v6  ;;  %v302_v8 = vunpack.c.h.b16 %v292_v6 }
  0x24   : > { %v1769_v11 = vpack.c.b16 %v301_v7, %v301_v7  ;;  %v1771_v12 = vpack.c.b16 %v302_v8, %v302_v8 }
  0x26   : > { %v311_v13 = vsel %vm309_vm0, %v1769_v11, 0  ;;  %v314_v14 = vsel %vm309_vm0, %v1771_v12, 0 }
  0x27   : > { %323 = vmatpush.bf16.msra.mxu3 %v311_v13  ;;  %337 = vmatpush.bf16.msra.mxu1 %v314_v14  ;;  %v363_v16 = vld.sshfl [vmem:[#allocation1] sm:$0xff pattern:$0x75316420]  ;;  %v364_v17 = vld.sshfl [vmem:[#allocation1 + $0x8] sm:$0xff pattern:$0x75316420] }
  0x28   : > { %v1560_v18 = vpack.i.bf16 %v364_v17, %v363_v16  ;;  %380 = vst [vmem:[#allocation1] ss:$2 sm:$0xff] %v226_v3 }
  0x2a   : > { %1458 = vmatmul.msk.bf16.vlgmr.msra.gmra.mxu3 %vm305_vm1, %v1457_v15  ;;  %1459 = vmatmul.msk.bf16.vlgmr.msra.gmra.mxu1 %vm305_vm1, %v1457_v15  ;;  %v488_v15 = vsel %vm1793_vm7, 65537, %v1645_v2 }
  0x2b   : > { %1561 = vrot.lane.b32.xlu0 %v1560_v18, %s1646_s23  ;;  %v490_v16 = vperm.slane %v488_v15, 4  ;;  %v449_v18 = vsel %vm1787_vm4, 65537, %v1645_v2 }
  0x2c   : > { %v451_v24 = vperm.slane %v449_v18, 4 }
  0x2f   : > { %v381_v19 = vld.sshfl [vmem:[#allocation1] sm:$0xff pattern:$0x75316420]  ;;  %v382_v20 = vld.sshfl [vmem:[#allocation1 + $0x8] sm:$0xff pattern:$0x75316420] }
  0x30   : > { %387 = vst [vmem:[#allocation1] ss:$2 sm:$0xff] %v226_v3 }
  0x37   : > { %v388_v21 = vld.sshfl [vmem:[#allocation1] sm:$0xff pattern:$0x75316420]  ;;  %v389_v22 = vld.sshfl [vmem:[#allocation1 + $0x8] sm:$0xff pattern:$0x75316420] }
  0x38   : > { %v1565_v23 = vpack.i.bf16 %v389_v22, %v388_v21  ;;  %v1898_v21 = vunpack.c.h.b16 %v1645_v2  ;;  %v498_v22 = vunpack.c.l.b16 %v490_v16 }
  0x3a   : > { %1566 = vrot.lane.b32.xlu1 %v1565_v23, %s1647_s25  ;;  %v499_v23 = vunpack.c.h.b16 %v490_v16 }
  0x3c   : > { %vm503_vm11 = vcmp.ne.s32.totalorder %v499_v23, %v1898_v21  ;;  %v278_v23 = vadd.s32 2, %v1779_v27 }
  0x87   : > { %v354_v35 = vpop.permute.xlu0 %353  ;;  %v349_v37 = vpop.permute.xlu1 %348 }
  0x9d   : > { %v1562_v36 = vpop.permute.xlu0 %1561 }
  0x9e   : > { %v1564_v38 = vunpack.i.h.bf16 %v1562_v36  ;;  %v1563_v39 = vunpack.i.l.bf16 %v1562_v36  ;;  %v450_v36 = vperm.slane %v449_v18, 0 }
  0xa0   : > { %v370_v40 = vsel %vm369_vm8, %v1563_v39, %v1564_v38  ;;  %v373_v41 = vsel %vm369_vm8, -1e+30, %v1563_v39  ;;  %v460_v38 = vunpack.c.h.b16 %v451_v24 }
  0xa1   : > { %v378_v42 = vsel %vm264_vm2, %v373_v41, -1e+30  ;;  %v379_v43 = vsel %vm265_vm3, %v370_v40, -1e+30 }
  0xa2   : > { %v385_v46 = vmax.f32 %v378_v42, %v381_v19  ;;  %v386_v47 = vmax.f32 %v379_v43, %v382_v20  ;;  %v489_v19 = vperm.slane %v488_v15, 0  ;;  %v1895_v20 = vunpack.c.l.b16 %v1645_v2 }
  0xa4   : > { %v491_v25 = vunpack.c.l.b16 %v489_v19  ;;  %v492_v26 = vunpack.c.h.b16 %v489_v19  ;;  %vm502_vm10 = vcmp.ne.s32.totalorder %v498_v22, %v1895_v20 }
  0xa5   : > { %vm1915_vm2 = vmpackc.low %vm503_vm11, %vm502_vm10 }
  0xa6   : > { %vm495_vm15 = vcmp.ne.s32.totalorder %v491_v25, %v1895_v20  ;;  %vm496_vm1 = vcmp.ne.s32.totalorder %v492_v26, %v1898_v21 }
  0xa7   : > { %v339_v44 = vpop.f32.mrf.mxu1  ;;  %vm1931_vm3 = vmpackc.low %vm496_vm1, %vm495_vm15  ;;  %vm2466_vm1 = vcmask 1045504  }
  0xa8   : > { %v357_v51 = vadd.f32 %v349_v37, %v339_v44 }
  0xac   : > { %v1567_v45 = vpop.permute.xlu1 %1566 }
  0xad   : > { %v1569_v48 = vunpack.i.h.bf16 %v1567_v45  ;;  %v1568_v49 = vunpack.i.l.bf16 %v1567_v45  ;;  %v325_v50 = vpop.f32.mrf.mxu3 }
  0xae   : > { %v356_v52 = vadd.f32 %v349_v37, %v325_v50  ;;  %v459_v37 = vunpack.c.l.b16 %v451_v24 }
  0xaf   : > { %v398_v53 = vsel %vm394_vm9, %v1569_v48, -1e+30  ;;  %v395_v54 = vsel %vm394_vm9, %v1568_v49, %v1569_v48  ;;  %v341_v3 = vpop.f32.mrf.mxu1  ;;  %v452_v49 = vunpack.c.l.b16 %v450_v36 }
  0xb0   : > { %v404_v55 = vsel %vm275_vm6, %v398_v53, -1e+30  ;;  %v403_v56 = vsel %vm274_vm5, %v395_v54, -1e+30  ;;  %v360_v57 = vpack.c.bf16 %v357_v51, %v356_v52  ;;  %v359_v5 = vadd.f32 %v354_v35, %v341_v3 }
  0xb1   : > { %v1803_v58 = vmax.f32 %v386_v47, %v404_v55  ;;  %v1805_v59 = vmax.f32 %v385_v46, %v403_v56  ;;  %v453_v52 = vunpack.c.h.b16 %v450_v36  ;;  %vm463_vm4 = vcmp.ne.s32.totalorder %v459_v37, %v1895_v20 }
  0xb2   : > { %v433_v60 = vunpack.c.h.b16 %v360_v57  ;;  %v432_v63 = vunpack.c.l.b16 %v360_v57  ;;  %vm464_vm5 = vcmp.ne.s32.totalorder %v460_v38, %v1898_v21  ;;  %vm2462_vm6 = vcmask 924672  }
  0xb3   : > { %v1575_v61 = vpack.i.bf16 %v1803_v58, %v1805_v59  ;;  %vm456_vm7 = vcmp.ne.s32.totalorder %v452_v49, %v1895_v20  ;;  %vm457_vm10 = vcmp.ne.s32.totalorder %v453_v52, %v1898_v21  ;;  %vm1958_vm11 = vmpackc.low %vm464_vm5, %vm463_vm4  ;;  %vm282_vm4 = vcmp.lt.s32.totalorder %v278_v23, 16 }
  0xb4   : > { %v1809_v62 = vpack.c.b16 %v433_v60, %v433_v60  ;;  %v1815_v0 = vpack.c.b16 %v432_v63, %v432_v63  ;;  %vm1968_vm15 = vmpackc.low %vm457_vm10, %vm456_vm7  ;;  %v254_v37 = vadd.s32 4294967294, %v1779_v27  ;;  %v255_v38 = vadd.s32 4294967294, %v1781_v28 }
  0xb5   : > { %1576 = vrot.lane.b32.xlu1 %v1575_v61, %s1648_s26  ;;  %1571 = vrot.lane.b32.xlu0 %v1575_v61, %s1649_s30  ;;  %v327_v1 = vpop.f32.mrf.mxu3 }
  0xb6   : > { %554 = vrot.lane.b32.xlu2 %v1809_v62, %s1650_s6  ;;  %v358_v4 = vadd.f32 %v354_v35, %v327_v1  ;;  %v910_v27 = vrot.slane %v1815_v0, 6  ;;  %vm256_vm10 = vcmp.ge.s32.totalorder %v254_v37, 0 }
  0xb8   : > { %v361_v6 = vpack.c.bf16 %v359_v5, %v358_v4  ;;  %v1191_v5 = vld [vmem:[%s2459_s4 + $0x8] sm:$0xff] }
  0xba   : > { %v566_v7 = vunpack.c.l.b16 %v361_v6  ;;  %v567_v9 = vunpack.c.h.b16 %v361_v6 }
  0xbc   : > { %v1835_v8 = vpack.c.b16 %v566_v7, %v566_v7  ;;  %v1849_v10 = vpack.c.b16 %v567_v9, %v567_v9 }
  0xbd   : > { %546 = vrot.lane.b32.xlu0 %v1809_v62, %s1648_s26  ;;  %552 = vrot.lane.b32.xlu1 %v1815_v0, %s1650_s6 }
  0xbe   : > { %544 = vrot.lane.b32.xlu2 %v1815_v0, %s1648_s26 }
  0xc5   : > { %521 = vrot.lane.b32.xlu0 %v1809_v62, %s1647_s25  ;;  %531 = vrot.lane.b32.xlu1 %v1815_v0, %s1651_s7 }
  0xc6   : > { %519 = vrot.lane.b32.xlu2 %v1815_v0, %s1647_s25 }
  0xcd   : > { %507 = vrot.lane.b32.xlu0 %v1815_v0, %s1646_s23  ;;  %468 = vrot.lane.b32.xlu1 %v1815_v0, %s1649_s30 }
  0xce   : > { %533 = vrot.lane.b32.xlu2 %v1809_v62, %s1651_s7 }
  0xd5   : > { %476 = vrot.lane.b32.xlu0 %v1815_v0, %s1652_s8  ;;  %688 = vrot.lane.b32.xlu1 %v1835_v8, %s1653_s9 }
  0xd6   : > { %509 = vrot.lane.b32.xlu2 %v1809_v62, %s1646_s23 }
  0xdd   : > { %754 = vrot.lane.b32.xlu1 %v1835_v8, %s1647_s25  ;;  %706 = vrot.lane.b32.xlu0 %v1835_v8, %s1652_s8 }
  0xde   : > { %743 = vrot.lane.b32.xlu2 %v1835_v8, %s1646_s23 }
  0xe5   : > { %701 = vrot.lane.b32.xlu1 %v1849_v10, %s1649_s30  ;;  %730 = vrot.lane.b32.xlu0 %v1835_v8, %s1654_s10 }
  0xe6   : > { %699 = vrot.lane.b32.xlu2 %v1835_v8, %s1649_s30 }
  0xed   : > { %719 = vrot.lane.b32.xlu1 %v1849_v10, %s1655_s11  ;;  %745 = vrot.lane.b32.xlu0 %v1849_v10, %s1646_s23  ;;  %s1662_s23 = smov 18  }
  0xee   : > { %717 = vrot.lane.b32.xlu2 %v1835_v8, %s1655_s11  ;;  %s1665_s11 = smov 110  }
  0xf5   : > { %627 = vrot.lane.b32.xlu1 %v1835_v8, %s1656_s12  ;;  %690 = vrot.lane.b32.xlu0 %v1849_v10, %s1653_s9 }
  0xf6   : > { %756 = vrot.lane.b32.xlu2 %v1849_v10, %s1647_s25  ;;  %s1663_s25 = smov 33  }
  0xfd   : > { %870 = vrot.lane.b32.xlu1 %v1849_v10, %s1657_s13  ;;  %618 = vrot.lane.b32.xlu0 %v1835_v8, %s1658_s14 }
  0xfe   : > { %708 = vrot.lane.b32.xlu2 %v1849_v10, %s1652_s8 }
 0x105   : > { %570 = vrot.lane.b32.xlu1 %v1835_v8, %s1659_s15  ;;  %640 = vrot.lane.b32.xlu0 %v1835_v8, %s1660_s16 }
 0x106   : > { %732 = vrot.lane.b32.xlu2 %v1849_v10, %s1654_s10  ;;  %s1664_s10 = smov 96  }
 0x10d   : > { %883 = vrot.lane.b32.xlu1 %v1849_v10, %s1661_s17  ;;  %868 = vrot.lane.b32.xlu0 %v1835_v8, %s1657_s13  ;;  %s1667_s13 = smov 98  }
 0x10e   : > { %675 = vrot.lane.b32.xlu2 %v1835_v8, %s1662_s23 }
 0x110   : > { %v1878_v13 = vpop.permute.xlu2 %554 }
 0x111   : > { %v561_v42 = vsel %vm2463_vm12, %v1878_v13, 0 }
 0x112   : > { %v564_v51 = vsel %vm1915_vm2, %v561_v42, 0 }
 0x113   : > { %v926_v60 = vrot.slane %v564_v51, 6 }
 0x115   : > { %607 = vrot.lane.b32.xlu1 %v1849_v10, %s1663_s25  ;;  %881 = vrot.lane.b32.xlu0 %v1835_v8, %s1661_s17 }
 0x116   : > { %605 = vrot.lane.b32.xlu2 %v1835_v8, %s1663_s25 }
 0x118   : > { %v545_v14 = vpop.permute.xlu2 %544 }
 0x11d   : > { %861 = vrot.lane.b32.xlu1 %v1849_v10, %s1664_s10  ;;  %629 = vrot.lane.b32.xlu0 %v1849_v10, %s1656_s12  ;;  %s1666_s12 = smov 97  }
 0x11e   : > { %677 = vrot.lane.b32.xlu2 %v1849_v10, %s1662_s23 }
 0x120   : > { %v1889_v17 = vpop.permute.xlu2 %519 }
 0x125   : > { %822 = vrot.lane.b32.xlu1 %v1849_v10, %s1665_s11  ;;  %859 = vrot.lane.b32.xlu0 %v1835_v8, %s1664_s10 }
 0x126   : > { %620 = vrot.lane.b32.xlu2 %v1849_v10, %s1658_s14  ;;  %s1668_s14 = smov 114  }
 0x127   : > { %v1577_v29 = vpop.permute.xlu1 %1576  ;;  %v1572_v30 = vpop.permute.xlu0 %1571 }
 0x128   : > { %v1579_v31 = vunpack.i.h.bf16 %v1577_v29  ;;  %v1578_v32 = vunpack.i.l.bf16 %v1577_v29  ;;  %v1574_v33 = vunpack.i.h.bf16 %v1572_v30  ;;  %v1573_v34 = vunpack.i.l.bf16 %v1572_v30  ;;  %v534_v35 = vpop.permute.xlu2 %533 }
 0x129   : > { %v540_v6 = vsel %vm2462_vm6, %v534_v35, 0  ;;  %v279_v29 = vadd.s32 2, %v1781_v28  ;;  %v911_v28 = vrot.slane %v1809_v62, 6 }
 0x12a   : > { %v414_v39 = vsel %vm2468_vm13, %v1573_v34, %v1574_v33  ;;  %v417_v40 = vsel %vm2468_vm13, -1e+30, %v1573_v34  ;;  %v428_v45 = vsel %vm2461_vm14, %v1579_v31, -1e+30  ;;  %v425_v46 = vsel %vm2461_vm14, %v1578_v32, %v1579_v31 }
 0x12b   : > { %v418_v43 = vmax.f32 %v417_v40, %v1805_v59  ;;  %v419_v44 = vmax.f32 %v414_v39, %v1803_v58  ;;  %vm283_vm5 = vcmp.lt.s32.totalorder %v279_v29, 16 }
 0x12c   : > { %vm655_vm7 = vmpackc.low %vm283_vm5, %vm282_vm4  ;;  %vm2465_vm5 = vcmask 121856  }
 0x12d   : > { %v429_v47 = vmax.f32 %v418_v43, %v425_v46  ;;  %v430_v48 = vmax.f32 %v419_v44, %v428_v45  ;;  %809 = vrot.lane.b32.xlu1 %v1835_v8, %s1650_s6  ;;  %820 = vrot.lane.b32.xlu0 %v1835_v8, %s1665_s11  ;;  %v2021_v49 = vsel %vm655_vm7, 65537, %v1645_v2 }
 0x12e   : > { %642 = vrot.lane.b32.xlu2 %v1849_v10, %s1660_s16 }
 0x12f   : > { %v1941_v53 = vpack.c.bf16 %v430_v48, %v429_v47  ;;  %v547_v54 = vpop.permute.xlu0 %546  ;;  %v553_v55 = vpop.permute.xlu1 %552 }
 0x130   : > { %v549_v56 = vsel %vm2461_vm14, %v545_v14, %v547_v54  ;;  %v551_v57 = vsel %vm2461_vm14, %v547_v54, 0  ;;  %v557_v58 = vsel %vm2463_vm12, %v553_v55, %v1878_v13  ;;  %v510_v59 = vpop.permute.xlu2 %509  ;;  %v543_v13 = vsel %vm1958_vm11, %v540_v6, 0 }
 0x131   : > { %v921_v61 = vrot.slane %v549_v56, 2  ;;  %v922_v63 = vrot.slane %v551_v57, 2  ;;  %v563_v1 = vsel %vm1931_vm3, %v557_v58, 0  ;;  %vm257_vm14 = vcmp.ge.s32.totalorder %v255_v38, 0 }
 0x132   : > { %v925_v3 = vrot.slane %v563_v1, 6  ;;  %vm585_vm4 = vmpackc.low %vm257_vm14, %vm256_vm10  ;;  %v657_v56 = vperm.slane %v2021_v49, 0  ;;  %vm2464_vm14 = vcmask 138240   ;;  %vm2467_vm12 = vcmask 1043456  }
 0x133   : > { %v1952_v4 = vsel %vm309_vm0, %v922_v63, %v926_v60  ;;  %v586_v60 = vsel %vm585_vm4, 65537, %v1645_v2  ;;  %vm721_vm4 = vcmask 113664  }
 0x134   : > { %v1964_v7 = vsel %vm309_vm0, %v921_v61, %v925_v3  ;;  %v587_v1 = vperm.slane %v586_v60, 0 }
 0x135   : > { %848 = vrot.lane.b32.xlu1 %v1849_v10, %s1666_s12  ;;  %835 = vrot.lane.b32.xlu0 %v1849_v10, %s1667_s13 }
 0x136   : > { %833 = vrot.lane.b32.xlu2 %v1835_v8, %s1667_s13  ;;  %v589_v6 = vunpack.c.l.b16 %v587_v1 }
 0x137   : > { %v522_v14 = vpop.permute.xlu0 %521  ;;  %v532_v15 = vpop.permute.xlu1 %531 }
 0x138   : > { %v524_v16 = vsel %vm394_vm9, %v1889_v17, %v522_v14  ;;  %v527_v18 = vsel %vm394_vm9, %v522_v14, 0  ;;  %v536_v19 = vsel %vm2462_vm6, %v532_v15, %v534_v35  ;;  %v1979_v22 = vpop.permute.xlu2 %743  ;;  %v919_v17 = vrot.slane %v543_v13, 6 }
 0x139   : > { %v529_v24 = vsel %vm1931_vm3, %v524_v16, 0  ;;  %v530_v25 = vsel %vm1915_vm2, %v527_v18, 0  ;;  %v542_v26 = vsel %vm1968_vm15, %v536_v19, 0  ;;  %v590_v13 = vunpack.c.h.b16 %v587_v1 }
 0x13a   : > { %v914_v30 = vrot.slane %v529_v24, 2  ;;  %v915_v31 = vrot.slane %v530_v25, 2  ;;  %v918_v32 = vrot.slane %v542_v26, 6  ;;  %v750_v18 = vsel %vm369_vm8, 0, %v1979_v22 }
 0x13c   : > { %v974_v33 = vsel %vm309_vm0, %v914_v30, %v918_v32  ;;  %v976_v34 = vsel %vm309_vm0, %v915_v31, %v919_v17  ;;  %v752_v17 = vsel %vm1968_vm15, %v750_v18, 0  ;;  %v588_v32 = vperm.slane %v586_v60, 4 }
 0x13d   : > { %778 = vrot.lane.b32.xlu1 %v1835_v8, %s1668_s14  ;;  %846 = vrot.lane.b32.xlu0 %v1835_v8, %s1666_s12  ;;  %v1995_v35 = vsel %vm2466_vm1, %v974_v33, %v921_v61  ;;  %v1998_v36 = vsel %vm2466_vm1, %v976_v34, %v922_v63  ;;  %v659_v61 = vunpack.c.l.b16 %v657_v56  ;;  %v660_v63 = vunpack.c.h.b16 %v657_v56  ;;  %s1601_s12 = scalar_lea.hbm %s2460_s5, 160 }
 0x13e   : > { %811 = vrot.lane.b32.xlu2 %v1849_v10, %s1650_s6  ;;  %s1669_s6 = smov 126   ;;  %v1023_v38 = vrot.slane %v752_v17, 6  ;;  %v658_v56 = vperm.slane %v2021_v49, 4 }
 0x13f   : > { %v508_v39 = vpop.permute.xlu0 %507  ;;  %v2004_v40 = vpop.permute.xlu1 %468  ;;  %vm663_vm7 = vcmp.ne.s32.totalorder %v659_v61, %v1895_v20  ;;  %vm664_vm10 = vcmp.ne.s32.totalorder %v660_v63, %v1898_v21  ;;  %v1190_v63 = vld [vmem:[%s2459_s4] sm:$0xff] }
 0x140   : > { %v512_v42 = vsel %vm369_vm8, %v508_v39, %v510_v59  ;;  %v515_v43 = vsel %vm369_vm8, 0, %v508_v39  ;;  %v2008_v44 = vpop.permute.xlu2 %699  ;;  %vm2067_vm6 = vmpackc.low %vm664_vm10, %vm663_vm7  ;;  %vm734_vm7 = vcmask 15360   ;;  %v666_v49 = vunpack.c.l.b16 %v658_v56 }
 0x141   : > { %v517_v45 = vsel %vm1968_vm15, %v515_v43, 0  ;;  %v518_v46 = vsel %vm1958_vm11, %v512_v42, 0  ;;  %v705_v19 = vsel %vm2468_vm13, 0, %v2008_v44 }
 0x142   : > { %v2016_v47 = vrot.slane %v517_v45, 2  ;;  %v2018_v48 = vrot.slane %v518_v46, 2 }
 0x144   : > { %v964_v51 = vsel %vm309_vm0, %v2016_v47, %v910_v27  ;;  %v966_v52 = vsel %vm309_vm0, %v2018_v48, %v911_v28  ;;  %v596_v28 = vunpack.c.l.b16 %v588_v32 }
 0x145   : > { %793 = vrot.lane.b32.xlu1 %v1849_v10, %s1651_s7  ;;  %791 = vrot.lane.b32.xlu0 %v1835_v8, %s1651_s7  ;;  %v2032_v54 = vsel %vm2466_vm1, %v964_v51, %v914_v30  ;;  %v2035_v55 = vsel %vm2466_vm1, %v966_v52, %v915_v31  ;;  %v1011_v30 = vrot.slane %v705_v19, 6  ;;  %v597_v51 = vunpack.c.h.b16 %v588_v32 }
 0x146   : > { %572 = vrot.lane.b32.xlu2 %v1849_v10, %s1659_s15 }
 0x147   : > { %v2040_v57 = vpop.permute.xlu0 %476  ;;  %v2042_v58 = vpop.permute.xlu1 %688 }
 0x148   : > { %v2044_v59 = vpop.permute.xlu2 %717  ;;  %v695_v14 = vsel %vm2464_vm14, 0, %v2042_v58  ;;  %vm593_vm14 = vcmp.ne.s32.totalorder %v589_v6, %v1895_v20 }
 0x149   : > { %v726_v25 = vsel %vm721_vm4, 0, %v2044_v59  ;;  %v697_v26 = vsel %vm1968_vm15, %v695_v14, 0 }
 0x14a   : > { %v728_v33 = vsel %vm2067_vm6, %v726_v25, 0  ;;  %v1054_v34 = vsel %vm309_vm0, %v697_v26, %v1011_v30 }
 0x14b   : > { %v1019_v46 = vrot.slane %v728_v33, 2 }
 0x14d   : > { %802 = vrot.lane.b32.xlu1 %v1835_v8, %s1648_s26  ;;  %767 = vrot.lane.b32.xlu0 %v1849_v10, %s1669_s6 }
 0x14e   : > { %780 = vrot.lane.b32.xlu2 %v1849_v10, %s1668_s14  ;;  %s215_s14 = sand.u32 1, %s1635_s19  }
 0x14f   : > { %v755_v2 = vpop.permute.xlu1 %754  ;;  %v2055_v3 = vpop.permute.xlu0 %706  ;;  %s1371_s17 = scalar_lea.sflag [#allocation3], %s215_s14 }
 0x150   : > { %v713_v15 = vsel %vm2465_vm5, 0, %v2055_v3  ;;  %v757_v16 = vpop.permute.xlu2 %756  ;;  %vm594_vm5 = vcmp.ne.s32.totalorder %v590_v13, %v1898_v21  ;;  %v667_v13 = vunpack.c.h.b16 %v658_v56 }
 0x151   : > { %v715_v23 = vsel %vm1931_vm3, %v713_v15, 0  ;;  %v758_v31 = vsel %vm394_vm9, %v755_v2, %v757_v16  ;;  %vm2089_vm10 = vmpackc.low %vm594_vm5, %vm593_vm14  ;;  %vm600_vm14 = vcmp.ne.s32.totalorder %v596_v28, %v1895_v20  ;;  %vm601_vm5 = vcmp.ne.s32.totalorder %v597_v51, %v1898_v21 }
 0x152   : > { %v1015_v29 = vrot.slane %v715_v23, 4  ;;  %v763_v39 = vsel %vm1931_vm3, %v758_v31, 0  ;;  %vm671_vm13 = vcmp.ne.s32.totalorder %v667_v13, %v1898_v21  ;;  %v761_v30 = vsel %vm394_vm9, %v757_v16, 0 }
 0x153   : > { %v1027_v60 = vrot.slane %v763_v39, 2  ;;  %vm2495_vm9 = vcmask 130048  }
 0x154   : > { %v1059_v45 = vsel %vm2467_vm12, %v1054_v34, %v1015_v29 }
 0x155   : > { %478 = vrot.lane.b32.xlu1 %v1809_v62, %s1652_s8  ;;  %436 = vrot.lane.b32.xlu0 %v1815_v0, %s1653_s9  ;;  %v1063_v1 = vsel %vm2466_vm1, %v1059_v45, %v1019_v46  ;;  %s1492_s8 = smul.u32 80, %s1722_s22 }
 0x156   : > { %765 = vrot.lane.b32.xlu2 %v1835_v8, %s1669_s6  ;;  %v1145_v14 = vrot.slane %v1063_v1, 6  ;;  %s1491_s6 = smul.u32 80, %s215_s14 }
 0x157   : > { %v702_v42 = vpop.permute.xlu1 %701  ;;  %v731_v43 = vpop.permute.xlu0 %730  ;;  %s1382_s15 = scalar_lea.hbm %s2460_s5, %s1492_s8 }
 0x158   : > { %v739_v0 = vsel %vm734_vm7, 0, %v731_v43  ;;  %v709_v27 = vpop.permute.xlu2 %708  ;;  %v703_v39 = vsel %vm2495_vm9, %v2008_v44, %v702_v42  ;;  %vm2471_vm9 = vcmask 261120   ;;  %s2408_s7 = scalar_lea.vmem [#allocation2], %s1491_s6  ;;  %s1385_s22 = sshll.u32 %s1382_s15, 4  ;;  %s1386_s22 = int_to_ptr.hbm [resolvable:$true] %s1385_s22 }
 0x159   : > { %v741_v52 = vsel %vm2089_vm10, %v739_v0, 0  ;;  %v1012_v44 = vrot.slane %v703_v39, 6  ;;  %s1383_s16 = sshll.u32 %s2408_s7, 4  ;;  %s1595_s23 = sshra.s32 %s1386_s22, 4  ;;  %s1384_s16 = int_to_ptr.vmem [resolvable:$true] %s1383_s16  ;;  %s1596_s23 = int_to_ptr.hbm [resolvable:$true] %s1595_s23 }
 0x15a   : > { %v1068_v61 = vsel %vm309_vm0, %v741_v52, %v1023_v38  ;;  %v764_v38 = vsel %vm1915_vm2, %v761_v30, 0  ;;  %s1597_s25 = scalar_lea.hbm %s1596_s23, 80  ;;  %p1602_p0 = scmp.lt.s32.totalorder %s1596_s23, %s2460_s5 }
 0x15b   : > { %v1073_v2 = vsel %vm2467_vm12, %v1068_v61, %v1835_v8  ;;  %vm670_vm12 = vcmp.ne.s32.totalorder %v666_v49, %v1895_v20  ;;  %v1192_v20 = vld [vmem:[%s2459_s4 + $0x10] sm:$0xff]  ;;  %v1028_v0 = vrot.slane %v764_v38, 2  ;;  %p1598_p11 = scmp.ne.s32.totalorder %s1596_s23, %s1597_s25  ;;  %p1603_p1 = scmp.lt.s32.totalorder %s1601_s12, %s1597_s25 }
 0x15c   : > { %v2108_v6 = vsel %vm2466_vm1, %v1073_v2, %v1027_v60  ;;  %vm2120_vm1 = vmpackc.low %vm601_vm5, %vm600_vm14 }
 0x15d   : > { %1197 = vperm.xlu1 %1559, %v1190_v63   ;;  %438 = vrot.lane.b32.xlu0 %v1809_v62, %s1653_s9  ;;  %v1147_v15 = vrot.slane %v2108_v6, 6  ;;  %vm2142_vm14 = vmpackc.low %vm671_vm13, %vm670_vm12  ;;  %vm679_vm12 = vcmask 146432   ;;  %vm2496_vm13 = vcmask 1043456   ;;  %p1599_p12 = pnand %p1598_p11, %p1739_p5  ;;  %p1604_p2 = por %p1603_p1, %p1602_p0 }
 0x15e   : > { %804 = vrot.lane.b32.xlu2 %v1849_v10, %s1648_s26  ;;  %vm2499_vm5 = vmmov %vm2496_vm13 }
 0x15f   : > { %v720_v8 = vpop.permute.xlu1 %719  ;;  %v746_v18 = vpop.permute.xlu0 %745  ;;  %v1148_v19 = vsel %vm309_vm0, %v1145_v14, %v1147_v15  ;;  %p1600_p13 = pneg %p1599_p12 }
 0x160   : > { %v747_v25 = vsel %vm369_vm8, %v1979_v22, %v746_v18  ;;  %1258 = vmatpush.bf16.msra.mxu2 %v1148_v19  ;;  %v733_v26 = vpop.permute.xlu2 %732  ;;  %v1193_v22 = vld [vmem:[%s2459_s4 + $0x18] sm:$0xff]  ;;  %vm2492_vm8 = vcmask 121856   ;;  %v722_v16 = vsel %vm721_vm4, %v2044_v59, %v720_v8  ;;  %vm2497_vm4 = vcmask 138240  }
 0x161   : > { %v753_v29 = vsel %vm1958_vm11, %v747_v25, 0  ;;  %v735_v17 = vsel %vm734_vm7, %v731_v43, %v733_v26  ;;  %v710_v21 = vsel %vm2492_vm8, %v2055_v3, %v709_v27  ;;  %v729_v59 = vsel %vm2142_vm14, %v722_v16, 0  ;;  %p1605_p3 = pnand %p1604_p2, %p1600_p13 }
 0x162   : > { %v1024_v31 = vrot.slane %v753_v29, 6  ;;  %v742_v32 = vsel %vm2120_vm1, %v735_v17, 0  ;;  %v716_v3 = vsel %vm1915_vm2, %v710_v21, 0  ;;  %v1020_v52 = vrot.slane %v729_v59, 2 }
 0x163   : > { %v1016_v28 = vrot.slane %v716_v3, 4  ;;  %vm2498_vm7 = vcmask 1045504  }
 0x164   : > { %v1071_v34 = vsel %vm309_vm0, %v742_v32, %v1024_v31  ;;  %vm2500_vm8 = vmmov %vm2498_vm7 }
 0x165   : > { %1212 = vperm.xlu1 %1559, %v1193_v22   ;;  %1207 = vperm.xlu0 %1558, %v1192_v20   ;;  %v1075_v46 = vsel %vm2496_vm13, %v1071_v34, %v1849_v10  ;;  %vm609_vm13 = vcmask 269312  }
 0x166   : > { %470 = vrot.lane.b32.xlu2 %v1809_v62, %s1649_s30  ;;  %v2172_v10 = vsel %vm2498_vm7, %v1075_v46, %v1028_v0  ;;  %vm2469_vm7 = vcmask 277504  }
 0x167   : > { %v2159_v43 = vpop.permute.xlu1 %627  ;;  %v691_v45 = vpop.permute.xlu0 %690  ;;  %v1149_v2 = vrot.slane %v2172_v10, 6 }
 0x168   : > { %v692_v42 = vsel %vm2497_vm4, %v2042_v58, %v691_v45  ;;  %v676_v27 = vpop.permute.xlu2 %675  ;;  %vm2470_vm4 = vcmask 252928  }
 0x169   : > { %v698_v62 = vsel %vm1958_vm11, %v692_v42, 0  ;;  %v684_v51 = vsel %vm679_vm12, 0, %v676_v27  ;;  %v636_v25 = vsel %vm2470_vm4, 0, %v2159_v43  ;;  %vm2503_vm4 = vcmask 121856  }
 0x16a   : > { %v1057_v56 = vsel %vm309_vm0, %v698_v62, %v1012_v44  ;;  %v686_v60 = vsel %vm2089_vm10, %v684_v51, 0  ;;  %v638_v17 = vsel %vm1931_vm3, %v636_v25, 0  ;;  %v485_v42 = vsel %vm2503_vm4, 0, %v2040_v57 }
 0x16b   : > { %v1171_v61 = vsel %vm309_vm0, %v686_v60, %v1145_v14  ;;  %v1061_v58 = vsel %vm2499_vm5, %v1057_v56, %v1016_v28  ;;  %vm644_vm5 = vcmask 244736   ;;  %v936_v16 = vrot.slane %v638_v17, 4 }
 0x16c   : > { %1259 = vmatpush.bf16.msra.mxu2 %v1171_v61  ;;  %v1065_v63 = vsel %vm2500_vm8, %v1061_v58, %v1020_v52  ;;  %vm2501_vm8 = vcmask 1043456   ;;  %v505_v52 = vsel %vm1931_vm3, %v485_v42, 0 }
 0x16d   : > { %v1146_v1 = vrot.slane %v1065_v63, 6  ;;  %v904_v60 = vrot.slane %v505_v52, 6 }
 0x16e   : > { %1202 = vperm.xlu2 %1580, %v1191_v5  }
 0x16f   : > { %v2178_v49 = vpop.permute.xlu1 %870  ;;  %v619_v13 = vpop.permute.xlu0 %618  ;;  %v1150_v8 = vsel %vm309_vm0, %v1146_v1, %v1149_v2 }
 0x170   : > { %1304 = vmatpush.bf16.msra.mxu0 %v1150_v8  ;;  %v606_v14 = vpop.permute.xlu2 %605  ;;  %v626_v18 = vsel %vm2471_vm9, 0, %v619_v13  ;;  %vm885_vm9 = vcmask 769024  }
 0x171   : > { %v614_v19 = vsel %vm609_vm13, 0, %v606_v14  ;;  %v932_v26 = vrot.slane %v626_v18, 6 }
 0x172   : > { %v616_v29 = vsel %vm1968_vm15, %v614_v19, 0 }
 0x173   : > { %v995_v21 = vsel %vm309_vm0, %v616_v29, %v932_v26 }
 0x174   : > { %v1001_v46 = vsel %vm2501_vm8, %v995_v21, %v936_v16  ;;  %vm2505_vm8 = vcmask 130048  }
 0x175   : > { %v2215_v56 = vsel %vm2505_vm8, 0, %v2004_v40  ;;  %vm2507_vm8 = vcmask 261120  }
 0x176   : > { %v900_v61 = vrot.slane %v2215_v56, 2 }
 0x177   : > { %v2191_v30 = vpop.permute.xlu1 %570  ;;  %v641_v31 = vpop.permute.xlu0 %640 }
 0x178   : > { %v579_v32 = vsel %vm2469_vm7, 0, %v2191_v30  ;;  %v649_v22 = vsel %vm644_vm5, 0, %v641_v31  ;;  %v678_v20 = vpop.permute.xlu2 %677  ;;  %vm2502_vm7 = vcmask 1045504  }
 0x179   : > { %v603_v34 = vsel %vm2089_vm10, %v579_v32, 0  ;;  %v673_v38 = vsel %vm2067_vm6, %v649_v22, 0  ;;  %v680_v39 = vsel %vm679_vm12, %v676_v27, %v678_v20  ;;  %vm2504_vm12 = vmmov %vm2502_vm7 }
 0x17a   : > { %v940_v3 = vrot.slane %v673_v38, 2  ;;  %v687_v59 = vsel %vm2120_vm1, %v680_v39, 0  ;;  %v929_v0 = vrot.slane %v603_v34, 2  ;;  %vm2506_vm4 = vmmov %vm2504_vm12  ;;  %v1117_v38 = vunpack.c.l.b16 %v1941_v53 }
 0x17b   : > { %v1175_v45 = vsel %vm309_vm0, %v687_v59, %v1146_v1  ;;  %v1118_v1 = vunpack.c.h.b16 %v1941_v53 }
 0x17c   : > { %1305 = vmatpush.bf16.msra.mxu0 %v1175_v45  ;;  %v1005_v44 = vsel %vm2502_vm7, %v1001_v46, %v940_v3  ;;  %v988_v27 = vsel %vm2504_vm12, %v1964_v7, %v929_v0  ;;  %vm872_vm7 = vcmask 777216   ;;  %vm863_vm12 = vcmask 785408  }
 0x17d   : > { %1260 = vmatpush.bf16.msra.mxu2 %v1005_v44  ;;  %v877_v8 = vsel %vm872_vm7, %v2178_v49, 0  ;;  %v1120_v19 = vpack.c.b16 %v1118_v1, %v1118_v1 }
 0x17e   : > { %v880_v25 = vsel %vm1915_vm2, %v877_v8, 0 }
 0x17f   : > { %v884_v28 = vpop.permute.xlu1 %883  ;;  %v869_v62 = vpop.permute.xlu0 %868  ;;  %v1111_v22 = vrot.slane %v880_v25, 6  ;;  %v1122_v34 = vrot.slane %v1120_v19, 2 }
 0x180   : > { %v621_v51 = vpop.permute.xlu2 %620  ;;  %v890_v18 = vsel %vm885_vm9, %v884_v28, 0 }
 0x181   : > { %1261 = vmatpush.bf16.msra.mxu2 %v988_v27  ;;  %v893_v26 = vsel %vm2142_vm14, %v890_v18, 0 }
 0x182   : > { %v1115_v20 = vrot.slane %v893_v26, 4 }
 0x185   : > { %1262 = vmatpush.bf16.msra.mxu2 %v1995_v35  ;;  %v954_v35 = vsel %vm309_vm0, %v900_v61, %v904_v60  ;;  %v1119_v60 = vpack.c.b16 %v1117_v38, %v1117_v38 }
 0x186   : > { %v958_v29 = vsel %vm2506_vm4, %v954_v35, %v2016_v47 }
 0x187   : > { %v608_v58 = vpop.permute.xlu1 %607  ;;  %v882_v63 = vpop.permute.xlu0 %881  ;;  %v1121_v25 = vrot.slane %v1119_v60, 2 }
 0x188   : > { %v643_v7 = vpop.permute.xlu2 %642  ;;  %v610_v17 = vsel %vm609_vm13, %v606_v14, %v608_v58  ;;  %vm2508_vm13 = vcmask 252928   ;;  %v886_v46 = vsel %vm885_vm9, %v882_v63, %v884_v28  ;;  %vm2511_vm9 = vmmov %vm2506_vm4 }
 0x189   : > { %1263 = vmatpush.bf16.msra.mxu2 %v2032_v54  ;;  %v645_v32 = vsel %vm644_vm5, %v641_v31, %v643_v7  ;;  %v623_v54 = vsel %vm2507_vm8, %v619_v13, %v621_v51  ;;  %v617_v39 = vsel %vm1958_vm11, %v610_v17, 0  ;;  %v873_v13 = vsel %vm872_vm7, %v869_v62, %v2178_v49 }
 0x18a   : > { %v674_v47 = vsel %vm2142_vm14, %v645_v32, 0  ;;  %v933_v59 = vrot.slane %v623_v54, 6  ;;  %vm2509_vm5 = vcmask 1043456   ;;  %v879_v49 = vsel %vm1931_vm3, %v873_v13, 0 }
 0x18b   : > { %v941_v42 = vrot.slane %v674_v47, 2  ;;  %vm2510_vm7 = vmmov %vm2509_vm5  ;;  %v892_v52 = vsel %vm2067_vm6, %v886_v46, 0  ;;  %v1110_v63 = vrot.slane %v879_v49, 6 }
 0x18c   : > { %v998_v51 = vsel %vm309_vm0, %v617_v39, %v933_v59  ;;  %v1114_v8 = vrot.slane %v892_v52, 4  ;;  %vm2512_vm8 = vmmov %vm2509_vm5 }
 0x18d   : > { %1264 = vmatpush.bf16.msra.mxu2 %v958_v29 }
 0x18f   : > { %v862_v21 = vpop.permute.xlu1 %861  ;;  %v630_v16 = vpop.permute.xlu0 %629 }
 0x190   : > { %v867_v14 = vsel %vm863_vm12, %v862_v21, 0  ;;  %v632_v31 = vsel %vm2508_vm13, %v2159_v43, %v630_v16  ;;  %v834_v3 = vpop.permute.xlu2 %833  ;;  %vm2513_vm13 = vmmov %vm2506_vm4 }
 0x191   : > { %v1127_v45 = vsel %vm309_vm0, %v867_v14, %v1111_v22  ;;  %v639_v53 = vsel %vm1915_vm2, %v632_v31, 0 }
 0x192   : > { %v937_v0 = vrot.slane %v639_v53, 4  ;;  %v1131_v44 = vsel %vm2509_vm5, %v1127_v45, %v1115_v20  ;;  %vm824_vm5 = vcmask 900096  }
 0x193   : > { %v2253_v43 = vsel %vm2506_vm4, %v1131_v44, %v1122_v34  ;;  %vm2515_vm4 = vcmask 908288  }
 0x194   : > { %v1003_v62 = vsel %vm2510_vm7, %v998_v51, %v937_v0  ;;  %v1168_v27 = vrot.slane %v2253_v43, 6  ;;  %vm2516_vm7 = vmmov %vm2511_vm9 }
 0x195   : > { %v1008_v28 = vsel %vm2511_vm9, %v1003_v62, %v941_v42  ;;  %vm850_vm9 = vcmask 793600  }
 0x196   : > { %1306 = vmatpush.bf16.msra.mxu0 %v1008_v28  ;;  %v1256_v58 = vsel %vm309_vm0, %v1168_v27, 0 }
 0x197   : > { %1331 = vmatpush.bf16.msrb.mxu1 %v1256_v58  ;;  %v823_v1 = vpop.permute.xlu1 %822  ;;  %v860_v7 = vpop.permute.xlu0 %859 }
 0x198   : > { %v864_v18 = vsel %vm863_vm12, %v860_v7, %v862_v21  ;;  %v812_v35 = vpop.permute.xlu2 %811  ;;  %v829_v16 = vsel %vm824_vm5, %v823_v1, 0  ;;  %vm2514_vm12 = vcmask 277504  }
 0x199   : > { %v1125_v19 = vsel %vm309_vm0, %v864_v18, %v1110_v63  ;;  %v832_v39 = vsel %vm2142_vm14, %v829_v16, 0  ;;  %v816_v47 = vsel %vm2515_vm4, %v812_v35, 0 }
 0x19a   : > { %v1129_v26 = vsel %vm2512_vm8, %v1125_v19, %v1114_v8  ;;  %vm837_vm8 = vcmask 801792   ;;  %v1043_v31 = vrot.slane %v832_v39, 6 }
 0x19b   : > { %v1133_v29 = vsel %vm2513_vm13, %v1129_v26, %v1121_v25  ;;  %vm2517_vm13 = vcmask 1043456  }
 0x19c   : > { %v1167_v17 = vrot.slane %v1133_v29, 6 }
 0x19e   : > { %v1254_v32 = vsel %vm309_vm0, %v1167_v17, 0 }
 0x19f   : > { %v810_v54 = vpop.permute.xlu1 %809  ;;  %1285 = vmatpush.bf16.msrb.mxu3 %v1254_v32  ;;  %v821_v22 = vpop.permute.xlu0 %820 }
 0x1a0   : > { %v573_v20 = vpop.permute.xlu2 %572  ;;  %v825_v45 = vsel %vm824_vm5, %v821_v22, %v823_v1  ;;  %vm2518_vm5 = vmmov %vm2516_vm7 }
 0x1a1   : > { %v575_v21 = vsel %vm2514_vm12, %v2191_v30, %v573_v20  ;;  %v819_v30 = vsel %vm1915_vm2, %v816_v47, 0  ;;  %v831_v52 = vsel %vm2067_vm6, %v825_v45, 0  ;;  %vm2519_vm12 = vmmov %vm2515_vm4 }
 0x1a2   : > { %v604_v34 = vsel %vm2120_vm1, %v575_v21, 0  ;;  %v1099_v62 = vsel %vm309_vm0, %v819_v30, %v1043_v31  ;;  %v1042_v63 = vrot.slane %v831_v52, 6  ;;  %vm2520_vm4 = vmmov %vm2517_vm13 }
 0x1a3   : > { %v930_v38 = vrot.slane %v604_v34, 2 }
 0x1a5   : > { %v991_v14 = vsel %vm2516_vm7, %v1952_v4, %v930_v38  ;;  %vm2521_vm7 = vmmov %vm2518_vm5 }
 0x1a6   : > { %1307 = vmatpush.bf16.msra.mxu0 %v991_v14 }
 0x1a7   : > { %v849_v13 = vpop.permute.xlu1 %848  ;;  %v836_v59 = vpop.permute.xlu0 %835 }
 0x1a8   : > { %v855_v53 = vsel %vm850_vm9, %v849_v13, 0  ;;  %v842_v46 = vsel %vm837_vm8, %v836_v59, 0  ;;  %v781_v0 = vpop.permute.xlu2 %780  ;;  %v838_v42 = vsel %vm837_vm8, %v834_v3, %v836_v59  ;;  %v813_v3 = vsel %vm2519_vm12, %v810_v54, %v812_v35 }
 0x1a9   : > { %v858_v44 = vsel %vm1958_vm11, %v855_v53, 0  ;;  %v845_v4 = vsel %vm2120_vm1, %v842_v46, 0  ;;  %v844_v28 = vsel %vm2089_vm10, %v838_v42, 0  ;;  %v818_v26 = vsel %vm1931_vm3, %v813_v3, 0 }
 0x1aa   : > { %v1051_v51 = vrot.slane %v858_v44, 2  ;;  %v1047_v49 = vrot.slane %v845_v4, 4  ;;  %1308 = vmatpush.bf16.msra.mxu0 %v1998_v36  ;;  %v1046_v1 = vrot.slane %v844_v28, 4  ;;  %vm2522_vm3 = vcmask 924672  }
 0x1ab   : > { %vm2523_vm8 = vmmov %vm2522_vm3 }
 0x1ac   : > { %v1103_v60 = vsel %vm2517_vm13, %v1099_v62, %v1047_v49  ;;  %vm769_vm13 = vcmask 1031168  }
 0x1ad   : > { %v2296_v58 = vsel %vm2518_vm5, %v1103_v60, %v1051_v51  ;;  %vm2524_vm5 = vcmask 916480  }
 0x1ae   : > { %1309 = vmatpush.bf16.msra.mxu0 %v2035_v55  ;;  %v1157_v36 = vrot.slane %v2296_v58, 6  ;;  %v1096_v55 = vsel %vm309_vm0, %v818_v26, %v1042_v63  ;;  %vm2525_vm12 = vmmov %vm2524_vm5  ;;  %v1487_v26 = vld [vmem:[%s2458_s3 + $0x4] sm:$0xf] }
 0x1af   : > { %v779_v7 = vpop.permute.xlu1 %778  ;;  %v847_v8 = vpop.permute.xlu0 %846  ;;  %v1101_v32 = vsel %vm2520_vm4, %v1096_v55, %v1046_v1 }
 0x1b0   : > { %v851_v18 = vsel %vm850_vm9, %v847_v8, %v849_v13  ;;  %v766_v19 = vpop.permute.xlu2 %765  ;;  %v1183_v25 = vsel %vm309_vm0, %v1157_v36, %v1168_v27  ;;  %vm782_vm9 = vcmask 932864  }
 0x1b1   : > { %v857_v35 = vsel %vm1968_vm15, %v851_v18, 0  ;;  %1332 = vmatpush.bf16.msrb.mxu1 %v1183_v25  ;;  %v787_v50 = vsel %vm782_vm9, %v781_v0, 0  ;;  %v783_v16 = vsel %vm782_vm9, %v779_v7, %v781_v0  ;;  %vm2532_vm9 = vcmask 138240  }
 0x1b2   : > { %v1050_v29 = vrot.slane %v857_v35, 2  ;;  %v790_v39 = vsel %vm2120_vm1, %v787_v50, 0  ;;  %v789_v47 = vsel %vm2089_vm10, %v783_v16, 0  ;;  %vm2526_vm1 = vmmov %vm2520_vm4  ;;  %v1489_v50 = vld [vmem:[%s2458_s3 + $0x14] sm:$0xf] }
 0x1b3   : > { %v1032_v31 = vrot.slane %v790_v39, 6  ;;  %v1031_v13 = vrot.slane %v789_v47, 6  ;;  %vm2527_vm10 = vmmov %vm2526_vm1  ;;  %v1472_v16 = vld [vmem:[%s2458_s3 + $0x18] sm:$0xf0]  ;;  %v1194_v39 = vld [vmem:[%s2459_s4 + $0x20] sm:$0xff] }
 0x1b4   : > { %v1105_v54 = vsel %vm2521_vm7, %v1101_v32, %v1050_v29  ;;  %vm2528_vm4 = vmmov %vm2521_vm7  ;;  %1217 = vperm.xlu2 %1580, %v1194_v39   ;;  %v1189_v47 = vld [vmem:[%s2458_s3 + $0x20] sm:$0xff] }
 0x1b5   : > { %v1155_v22 = vrot.slane %v1105_v54, 6  ;;  %vm2529_vm7 = vmmov %vm2528_vm4  ;;  %v1488_v54 = vld [vmem:[%s2458_s3 + $0x4] sm:$0xf0] }
 0x1b7   : > { %v794_v20 = vpop.permute.xlu1 %793  ;;  %v792_v43 = vpop.permute.xlu0 %791  ;;  %v1179_v27 = vsel %vm309_vm0, %v1155_v22, %v1167_v17 }
 0x1b8   : > { %1286 = vmatpush.bf16.msrb.mxu3 %v1179_v27  ;;  %v798_v21 = vsel %vm2522_vm3, %v794_v20, 0  ;;  %v805_v34 = vpop.permute.xlu2 %804  ;;  %v795_v38 = vsel %vm2523_vm8, %v792_v43, %v794_v20  ;;  %vm2534_vm3 = vmmov %vm2528_vm4 }
 0x1b9   : > { %v801_v14 = vsel %vm1958_vm11, %v798_v21, 0  ;;  %v800_v17 = vsel %vm1968_vm15, %v795_v38, 0  ;;  %v808_v59 = vsel %vm2524_vm5, %v805_v34, 0  ;;  %vm2535_vm8 = vmmov %vm2532_vm9  ;;  %v1490_v21 = vld [vmem:[%s2458_s3 + $0x14] sm:$0xf0] }
 0x1ba   : > { %v1036_v53 = vrot.slane %v801_v14, 4  ;;  %v1035_v37 = vrot.slane %v800_v17, 4  ;;  %v1039_v51 = vrot.slane %v808_v59, 2  ;;  %v1234_v14 = vunpack.c.h.b16 %v1189_v47 }
 0x1bb   : > { %v1233_v17 = vunpack.c.l.b16 %v1189_v47 }
 0x1bf   : > { %v803_v30 = vpop.permute.xlu1 %802  ;;  %v768_v45 = vpop.permute.xlu0 %767 }
 0x1c0   : > { %v806_v23 = vsel %vm2525_vm12, %v803_v30, %v805_v34  ;;  %v770_v46 = vsel %vm769_vm13, %v766_v19, %v768_v45  ;;  %v774_v0 = vsel %vm769_vm13, %v768_v45, 0  ;;  %v471_v60 = vpop.permute.xlu2 %470  ;;  %vm2536_vm13 = vmmov %vm2534_vm3  ;;  %v1475_v34 = vor.u32 %v1489_v50, %v1472_v16 }
 0x1c1   : > { %v1038_v44 = vrot.slane %v806_v23, 2  ;;  %v776_v42 = vsel %vm2067_vm6, %v770_v46, 0  ;;  %v777_v4 = vsel %vm2142_vm14, %v774_v0, 0  ;;  %vm2530_vm6 = vcmask 130048  }
 0x1c2   : > { %v1082_v49 = vsel %vm309_vm0, %v776_v42, %v1031_v13  ;;  %v1085_v62 = vsel %vm309_vm0, %v777_v4, %v1032_v31  ;;  %v473_v33 = vsel %vm2530_vm6, %v2004_v40, %v471_v60  ;;  %vm2531_vm14 = vcmask 121856   ;;  %v1464_v40 = vld [vmem:[%s2458_s3 + $0x8] sm:$0xf0] }
 0x1c3   : > { %v1087_v52 = vsel %vm2526_vm1, %v1082_v49, %v1035_v37  ;;  %v1089_v28 = vsel %vm2527_vm10, %v1085_v62, %v1036_v53  ;;  %v901_v55 = vrot.slane %v473_v33, 2  ;;  %v1467_v9 = vor.u32 %v1487_v26, %v1464_v40 }
 0x1c4   : > { %v1091_v58 = vsel %vm2528_vm4, %v1087_v52, %v1038_v44  ;;  %v1093_v3 = vsel %vm2529_vm7, %v1089_v28, %v1039_v51  ;;  %v1240_v31 = vpack.c.b16 %v1234_v14, %v1234_v14  ;;  %v1239_v13 = vpack.c.b16 %v1233_v17, %v1233_v17 }
 0x1c5   : > { %v1151_v63 = vrot.slane %v1091_v58, 6  ;;  %v1153_v24 = vrot.slane %v1093_v3, 6 }
 0x1c7   : > { %v479_v1 = vpop.permute.xlu1 %478  ;;  %v437_v7 = vpop.permute.xlu0 %436  ;;  %v1156_v8 = vsel %vm309_vm0, %v1151_v63, %v1155_v22  ;;  %v1158_v18 = vsel %vm309_vm0, %v1153_v24, %v1157_v36  ;;  %v1152_v22 = vsel %vm309_vm0, %v1147_v15, %v1151_v63  ;;  %v1154_v41 = vsel %vm309_vm0, %v1149_v2, %v1153_v24 }
 0x1c8   : > { %v481_v19 = vsel %vm2531_vm14, %v2040_v57, %v479_v1  ;;  %v446_v25 = vsel %vm2532_vm9, 0, %v437_v7  ;;  %1287 = vmatpush.bf16.msrb.mxu3 %v1156_v8  ;;  %1333 = vmatpush.bf16.msrb.mxu1 %v1158_v18  ;;  %v1462_v57 = vld [vmem:[%s2458_s3] sm:$0xf]  ;;  %v1203_v49 = vpop.permute.xlu2 %1202 }
 0x1c9   : > { %v506_v35 = vsel %vm1915_vm2, %v481_v19, 0  ;;  %v466_v36 = vsel %vm1968_vm15, %v446_v25, 0  ;;  %vm1244_vm2 = vcmask 424960   ;;  %vm2533_vm15 = vmmov %vm2528_vm4  ;;  %v1463_v15 = vor.u32 %v1488_v54, %v1462_v57 }
 0x1ca   : > { %v905_v29 = vrot.slane %v506_v35, 6  ;;  %v897_v32 = vrot.slane %v466_v36, 6 }
 0x1cc   : > { %1288 = vmatpush.bf16.msrb.mxu3 %v1152_v22  ;;  %1334 = vmatpush.bf16.msrb.mxu1 %v1154_v41  ;;  %v943_v20 = vsel %vm309_vm0, %v1769_v11, %v897_v32  ;;  %v956_v43 = vsel %vm309_vm0, %v901_v55, %v905_v29 }
 0x1cd   : > { %v948_v27 = vsel %vm2533_vm15, %v943_v20, %v900_v61  ;;  %v961_v6 = vsel %vm2534_vm3, %v956_v43, %v2018_v48 }
 0x1ce   : > { %1265 = vmatpush.bf16.msra.mxu2 %v948_v27  ;;  %1310 = vmatpush.bf16.msra.mxu0 %v961_v6 }
 0x1cf   : > { %v439_v10 = vpop.permute.xlu0 %438  ;;  %1476 = vmatmul.msk.bf16.vlgmr.msrb.gmra.mxu3 %vm1244_vm2, %v1467_v9  ;;  %1479 = vmatmul.msk.bf16.vlgmr.msrb.gmra.mxu1 %vm1244_vm2, %v1467_v9  ;;  %v1198_v45 = vpop.permute.xlu1 %1197 }
 0x1d0   : > { %v441_v11 = vsel %vm2535_vm8, %v437_v7, %v439_v10 }
 0x1d1   : > { %v467_v2 = vsel %vm1958_vm11, %v441_v11, 0  ;;  %1266 = vmatmul.bf16.vlgmr.msra.gmra.mxu2 %v1463_v15 }
 0x1d2   : > { %v898_v56 = vrot.slane %v467_v2, 6 }
 0x1d4   : > { %v945_v61 = vsel %vm309_vm0, %v1771_v12, %v898_v56  ;;  %v1470_v12 = vld [vmem:[%s2458_s3 + $0x10] sm:$0xf] }
 0x1d5   : > { %v951_v48 = vsel %vm2536_vm13, %v945_v61, %v901_v55  ;;  %v1471_v38 = vor.u32 %v1490_v21, %v1470_v12 }
 0x1d6   : > { %1311 = vmatpush.bf16.msra.mxu0 %v951_v48 }
 0x1d7   : > { %v1208_v7 = vpop.permute.xlu0 %1207  ;;  %v1213_v29 = vpop.permute.xlu1 %1212 }
 0x1d9   : > { %1312 = vmatmul.bf16.vlgmr.msra.gmra.mxu0 %v1463_v15 }
 0x1df   : > { %1477 = vmatmul.msk.bf16.gmra.mxu3 %vm1244_vm2, %v1475_v34  ;;  %1480 = vmatmul.msk.bf16.gmra.mxu1 %vm1244_vm2, %v1475_v34 }
 0x1e1   : > { %1271 = vmatmul.bf16.gmra.mxu2 %v1471_v38 }
 0x1e9   : > { %1317 = vmatmul.bf16.gmra.mxu0 %v1471_v38 }
 0x1ef   : > { %1478 = vmatmul.msk.bf16.gmra.mxu3 %vm1244_vm2, %v1240_v31  ;;  %1481 = vmatmul.msk.bf16.gmra.mxu1 %vm1244_vm2, %v1240_v31 }
 0x1f1   : > { %1276 = vmatmul.bf16.gmra.mxu2 %v1239_v13 }
 0x1f9   : > { %1322 = vmatmul.bf16.gmra.mxu0 %v1239_v13 }
 0x20e   : > { %v1218_v11 = vpop.permute.xlu2 %1217 }
 0x24c   : > { %v1336_v59 = vpop.f32.mrf.mxu1 }
 0x252   : > { %v1290_v30 = vpop.f32.mrf.mxu3 }
 0x254   : > { %v1267_v53 = vpop.f32.mrf.mxu2  ;;  %v1338_v23 = vpop.f32.mrf.mxu1 }
 0x255   : > { %v1268_v46 = vadd.f32 %v1267_v53, %v1198_v45 }
 0x256   : > { %v1313_v0 = vpop.f32.mrf.mxu0 }
 0x257   : > { %v1291_v37 = vadd.f32 %v1290_v30, %v1268_v46  ;;  %v1314_v44 = vadd.f32 %v1313_v0, %v1198_v45 }
 0x259   : > { %v1350_v42 = vmax.f32 %v1291_v37, 0.0  ;;  %v1337_v4 = vadd.f32 %v1336_v59, %v1314_v44 }
 0x25a   : > { %v1292_v51 = vpop.f32.mrf.mxu3 }
 0x25b   : > { %1360 = vst [vmem:[%s2408_s7] sm:$0xff] %v1350_v42  ;;  %v1351_v62 = vmax.f32 %v1337_v4, 0.0 }
 0x25c   : > { %v1269_v52 = vpop.f32.mrf.mxu2  ;;  %v1341_v28 = vpop.f32.mrf.mxu1 }
 0x25d   : > { %1361 = vst [vmem:[%s2408_s7 + $0x8] sm:$0xff] %v1351_v62  ;;  %v1270_v60 = vadd.f32 %v1269_v52, %v1203_v49 }
 0x25e   : > { %v1315_v58 = vpop.f32.mrf.mxu0 }
 0x25f   : > { %v1293_v3 = vadd.f32 %v1292_v51, %v1270_v60  ;;  %v1316_v63 = vadd.f32 %v1315_v58, %v1203_v49 }
 0x261   : > { %v1352_v24 = vmax.f32 %v1293_v3, 0.0  ;;  %v1339_v33 = vadd.f32 %v1338_v23, %v1316_v63 }
 0x262   : > { %v1295_v1 = vpop.f32.mrf.mxu3 }
 0x263   : > { %1362 = vst [vmem:[%s2408_s7 + $0x10] sm:$0xff] %v1352_v24  ;;  %v1353_v8 = vmax.f32 %v1339_v33, 0.0 }
 0x264   : > { %v1272_v18 = vpop.f32.mrf.mxu2  ;;  %v1343_v19 = vpop.f32.mrf.mxu1 }
 0x265   : > { %1363 = vst [vmem:[%s2408_s7 + $0x18] sm:$0xff] %v1353_v8  ;;  %v1273_v25 = vadd.f32 %v1272_v18, %v1208_v7 }
 0x266   : > { %v1318_v26 = vpop.f32.mrf.mxu0 }
 0x267   : > { %v1296_v40 = vadd.f32 %v1295_v1, %v1273_v25  ;;  %v1319_v35 = vadd.f32 %v1318_v26, %v1208_v7 }
 0x269   : > { %v1354_v36 = vmax.f32 %v1296_v40, 0.0  ;;  %v1342_v57 = vadd.f32 %v1341_v28, %v1319_v35 }
 0x26a   : > { %v1297_v55 = vpop.f32.mrf.mxu3 }
 0x26b   : > { %1364 = vst [vmem:[%s2408_s7 + $0x20] sm:$0xff] %v1354_v36  ;;  %v1355_v32 = vmax.f32 %v1342_v57, 0.0 }
 0x26c   : > { %v1274_v54 = vpop.f32.mrf.mxu2  ;;  %v1346_v22 = vpop.f32.mrf.mxu1 }
 0x26d   : > { %1365 = vst [vmem:[%s2408_s7 + $0x28] sm:$0xff] %v1355_v32  ;;  %v1275_v41 = vadd.f32 %v1274_v54, %v1213_v29 }
 0x26e   : > { %v1320_v9 = vpop.f32.mrf.mxu0 }
 0x26f   : > { %v1298_v20 = vadd.f32 %v1297_v55, %v1275_v41  ;;  %v1321_v43 = vadd.f32 %v1320_v9, %v1213_v29 }
 0x271   : > { %v1356_v27 = vmax.f32 %v1298_v20, 0.0  ;;  %v1344_v6 = vadd.f32 %v1343_v19, %v1321_v43 }
 0x272   : > { %v1300_v15 = vpop.f32.mrf.mxu3 }
 0x273   : > { %1366 = vst [vmem:[%s2408_s7 + $0x30] sm:$0xff] %v1356_v27  ;;  %v1357_v10 = vmax.f32 %v1344_v6, 0.0 }
 0x274   : > { %v1277_v2 = vpop.f32.mrf.mxu2  ;;  %v1348_v56 = vpop.f32.mrf.mxu1 }
 0x275   : > { %1367 = vst [vmem:[%s2408_s7 + $0x38] sm:$0xff] %v1357_v10  ;;  %v1278_v61 = vadd.f32 %v1277_v2, %v1218_v11 }
 0x276   : > { %v1323_v48 = vpop.f32.mrf.mxu0 }
 0x277   : > { %v1301_v50 = vadd.f32 %v1300_v15, %v1278_v61  ;;  %v1324_v16 = vadd.f32 %v1323_v48, %v1218_v11 }
 0x279   : > { %v1358_v5 = vmax.f32 %v1301_v50, 0.0  ;;  %v1347_v12 = vadd.f32 %v1346_v22, %v1324_v16 }
 0x27a   : > { %v1302_v21 = vpop.f32.mrf.mxu3 }
 0x27b   : > { %1368 = vst [vmem:[%s2408_s7 + $0x40] sm:$0xff] %v1358_v5  ;;  %v1359_v34 = vmax.f32 %v1347_v12, 0.0 }
 0x27c   : > { %v1279_v38 = vpop.f32.mrf.mxu2 }
 0x27d   : > { %1369 = vst [vmem:[%s2408_s7 + $0x48] sm:$0xff] %v1359_v34 }
 0x27e   : > { %v1325_v39 = vpop.f32.mrf.mxu0 }
 0x27f   : > { %1608 = shalt.err (!%p1605_p3)
}
 0x280   : > { %s1670_s14 = smov 256  }
 0x281   : > { %1493 = dma.vmem_to_hbm [thread:$0]  (%p1739_p5), %s1384_s16, 1280, %s1386_s22, %s1371_s17, %s1670_s14, %s1670_s14, %s1649_s30  }
 0x282 PF: > { %p1499_p4 = scmp.ge.s32.totalorder %s1643_s21, 2  ;;  %s1400_s7 = sand.u32 1, %s1631_s18  }
 0x283   : > { %s1401_s8 = scalar_lea.sflag [#allocation3], %s1400_s7 }
 0x284   : > { %p1496_p7 = pnand %p1499_p4, %p1743_p6 }
 0x286   : > { %p1497_p8 = pneg %p1496_p7 }
 0x288   : > { %1626 = dma.done.wait (%p1497_p8), %s1401_s8, 1280  }
 0x289   : > { %1628 = vsyncadd (%p1497_p8), %s1401_s8, 4294966016  ;;  %p15_p9 = scmp.ge.s32.totalorder %s1726_s24, 4   ;;  %s2537_s18 = smov %s1635_s19 }
 0x28a   : > { %s2538_s19 = smov %s1639_s20  ;;  %s2539_s20 = smov %s1737_s27 }
 0x28b   : > { %s2540_s21 = smov %s1726_s24  ;;  %17 = sbr.rel (!%p15_p9) target bundleno = 3 (0x3), region = 75 }
 0x290   :  { %1407 = vsyncpa [#allocation3], 1 }
 0x291   :  { %1409 = vsyncpa [#allocation3 + $0x1], 1 }

</bundles_post_ra>
